<compile_context>
chip_gen: v7x
topology: tpu7x:2x2x1
jax: 0.10.0
libtpu: 0.0.40
codegen_flags: <defaults>
</compile_context>

<pallas_src>
import jax
import jax.numpy as jnp
from jax.experimental import pallas as pl
from jax.experimental.pallas import tpu as pltpu

HIDDEN = 32
LANE = 128            # batch tile size: batch lives on the lane axis


# ---------------------------------------------------------------------------
# Fused kernel: logits rows -> masked greedy decode -> closed-tour reward.
#   x_ref      : (F, S, TB) VMEM   city coords, batch on lanes
#   g_ref      : (S, F)     SMEM   G = q_steps @ w_embed.T (scalar reads)
#   rawp_ref   : (S, S, TB)        masked softmax rows
#   probs_ref  : (S, TB)           prob of the greedy action per step
#   act_ref    : (S, TB) int32     greedy action per step
#   r_ref      : (1, TB)           closed-tour Euclidean length
#   logits_ref : (S, S, TB)        unmasked logits
# ---------------------------------------------------------------------------
def _solver_kernel(x_ref, g_ref, rawp_ref, probs_ref, act_ref, r_ref, logits_ref):
    F, S, TB = x_ref.shape
    NEG = jnp.float32(-1e9)

    x = x_ref[...]                                           # (F, S, TB)
    city = jax.lax.broadcasted_iota(jnp.int32, (S, TB), 0)   # city id per sublane

    mask = jnp.zeros((S, TB), jnp.float32)
    total = jnp.zeros((1, TB), jnp.float32)
    first = None
    prev = None

    # S is a small compile-time constant -> static unroll.
    # TODO(synk): for large S switch to lax.fori_loop with (mask, prev, total)
    #             carries and dynamic pl.ds row stores.
    for s in range(S):
        # logits row s = sum_f g[s,f] * x[f]: scalar(SMEM) x vreg MACs (no MXU).
        row = g_ref[s, 0] * x[0]
        for f in range(1, F):
            row = row + g_ref[s, f] * x[f]
        logits_ref[s] = row                                  # direct per-step store

        # masked softmax over cities (cities on sublanes, batch on lanes)
        masked = row + mask                                  # (S, TB)
        m = jnp.max(masked, axis=0, keepdims=True)           # (1, TB)
        e = jnp.exp(masked - m)
        denom = jnp.sum(e, axis=0, keepdims=True)            # (1, TB)
        inv = pl.reciprocal(denom, approx=True)              # EUP, VALU stays free
        rawp_ref[s] = e * inv                                # masked softmax row
        probs_ref[pl.ds(s, 1), :] = inv                      # prob of argmax = 1/denom

        # greedy argmax (first-tie) + one-hot gather of the chosen coords
        a = jnp.min(jnp.where(masked >= m, city, S), axis=0, keepdims=True)  # (1,TB)
        act_ref[pl.ds(s, 1), :] = a
        oh = (city == a).astype(jnp.float32)                 # (S, TB) one-hot
        mask = mask + oh * NEG                               # never revisit
        coord = [jnp.sum(oh * x[f], axis=0, keepdims=True) for f in range(F)]

        # online closed-tour length accumulation
        if s == 0:
            first = coord
        else:
            d2 = (coord[0] - prev[0]) ** 2
            for f in range(1, F):
                d2 = d2 + (coord[f] - prev[f]) ** 2
            total = total + jnp.sqrt(d2)
        prev = coord

    # closing edge back to the first city
    d2 = (first[0] - prev[0]) ** 2
    for f in range(1, F):
        d2 = d2 + (first[f] - prev[f]) ** 2
    r_ref[...] = total + jnp.sqrt(d2)


@jax.jit
def solver_forward(inputs, w_embed, q_steps):
    """Mirror of Solver.forward: returns (raw_probs, probs, actions, R, logits)."""
    B, S, F = inputs.shape

    # Algebraic fusion: Q @ (x W)^T == (Q W^T) @ x^T -> only G:(S,F) enters the
    # kernel; the per-batch embed matmul disappears.
    g = jnp.dot(q_steps, w_embed.T)                          # (S, F), tiny

    # Batch on the lane axis; pad to a multiple of 128 so every block is
    # (8,128)-aligned and stores are unmasked (no divisor search / tb=1 traps).
    xt = jnp.transpose(inputs, (2, 1, 0))                    # (F, S, B)
    TB = LANE
    Bp = -(-B // TB) * TB
    if Bp != B:
        xt = jnp.pad(xt, ((0, 0), (0, 0), (0, Bp - B)))      # zero-pad batch
    grid = (Bp // TB,)   # >=2 "parallel" steps for B>128 -> megacore on v7x

    # VMEM per tile (double-buffered): 2 big outputs * 2 bufs * S*S*TB*4 B;
    # at S=8, TB=128 that is ~256 KiB -- far under every generation's limit.
    out_shapes = (
        jax.ShapeDtypeStruct((S, S, Bp), jnp.float32),       # raw_probs (batch-last)
        jax.ShapeDtypeStruct((S, Bp), jnp.float32),          # probs
        jax.ShapeDtypeStruct((S, Bp), jnp.int32),            # actions
        jax.ShapeDtypeStruct((1, Bp), jnp.float32),          # R
        jax.ShapeDtypeStruct((S, S, Bp), jnp.float32),       # logits
    )
    out_specs = (
        pl.BlockSpec((S, S, TB), lambda i: (0, 0, i)),
        pl.BlockSpec((S, TB), lambda i: (0, i)),
        pl.BlockSpec((S, TB), lambda i: (0, i)),
        pl.BlockSpec((1, TB), lambda i: (0, i)),
        pl.BlockSpec((S, S, TB), lambda i: (0, 0, i)),
    )
    in_specs = [
        pl.BlockSpec((F, S, TB), lambda i: (0, 0, i)),
        pl.BlockSpec(memory_space=pltpu.MemorySpace.SMEM),   # g: scalar reads
    ]

    rawp_l, probs_l, act_l, r_l, logits_l = pl.pallas_call(
        _solver_kernel,
        out_shape=out_shapes,
        grid=grid,
        in_specs=in_specs,
        out_specs=out_specs,
        compiler_params=pltpu.CompilerParams(
            dimension_semantics=("parallel",)),
    )(xt, g)

    # back to the PyTorch batch-first convention, drop batch padding
    raw_probs = jnp.transpose(rawp_l, (2, 0, 1))[:B]
    probs = probs_l.T[:B]
    actions = act_l.T[:B]
    R = r_l[0, :B]
    logits = jnp.transpose(logits_l, (2, 0, 1))[:B]
    return raw_probs, probs, actions, R, logits


if __name__ == "__main__":
    B, S, FEAT = 2, 8, 2            # batch x seq_len x feature (2-D city coords)
    key = jax.random.PRNGKey(0)
    k_x, k_w, k_q = jax.random.split(key, 3)
    inputs = jax.random.uniform(k_x, (B, S, FEAT), dtype=jnp.float32)
    w_embed = 0.1 * jax.random.normal(k_w, (FEAT, HIDDEN), dtype=jnp.float32)
    q_steps = 0.1 * jax.random.normal(k_q, (S, HIDDEN), dtype=jnp.float32)

    raw_probs, probs, actions, R, logits = solver_forward(inputs, w_embed, q_steps)
    jax.block_until_ready((raw_probs, probs, actions, R, logits))

    assert raw_probs.shape == (B, S, S)
    assert probs.shape == (B, S)
    assert actions.shape == (B, S)
    assert R.shape == (B,)
    assert logits.shape == (B, S, S)

    # sanity: each decoded tour is a permutation of the cities
    assert bool(jnp.all(jnp.sort(actions, axis=1)
                        == jnp.arange(S, dtype=jnp.int32)[None, :]))

    # pure-JAX reference checks (same math)
    G = q_steps @ w_embed.T                                  # (S, F)
    ref_logits = jnp.einsum("sf,btf->bst", G, inputs)
    assert bool(jnp.allclose(logits, ref_logits, rtol=1e-4, atol=1e-5))

    idx = jnp.broadcast_to(actions[..., None], (B, S, FEAT))
    tour = jnp.take_along_axis(inputs, idx, axis=1)
    ref_R = jnp.sqrt(((jnp.roll(tour, -1, axis=1) - tour) ** 2).sum(-1)).sum(-1)
    assert bool(jnp.allclose(R, ref_R, rtol=1e-4, atol=1e-5))

    # raw_probs rows are (approx-reciprocal) masked softmaxes; probs is the
    # entry of the chosen (greedy) action.
    assert bool(jnp.all(jnp.abs(raw_probs.sum(-1) - 1.0) < 1e-2))
    chosen = jnp.take_along_axis(raw_probs, actions[..., None], axis=-1)[..., 0]
    assert bool(jnp.allclose(probs, chosen, rtol=1e-5, atol=1e-6))

    print("KERNEL_OK")
</pallas_src>

<mosaic_0001>
module attributes {stable_mosaic.version = 11 : i64} {
  func.func @_solver_kernel(%arg0: i32, %arg1: memref<2x8x128xf32, #tpu.memory_space<vmem>>, %arg2: memref<8x2xf32, #tpu.memory_space<smem>>, %arg3: memref<8x8x128xf32, #tpu.memory_space<vmem>>, %arg4: memref<8x128xf32, #tpu.memory_space<vmem>>, %arg5: memref<8x128xi32, #tpu.memory_space<vmem>>, %arg6: memref<1x128xf32, #tpu.memory_space<vmem>>, %arg7: memref<8x8x128xf32, #tpu.memory_space<vmem>>) attributes {dimension_semantics = [#tpu.dimension_semantics<parallel>], iteration_bounds = array<i64: 1>, scalar_prefetch = 0 : i64, scratch_operands = 0 : i64, tpu.core_type = #tpu.core_type<tc>, window_params = [{transform_indices = @transform_0, window_bounds = array<i64: 2, 8, 128>}, {transform_indices = @transform_1, window_bounds = array<i64: 8, 2>}, {transform_indices = @transform_2, window_bounds = array<i64: 8, 8, 128>}, {transform_indices = @transform_3, window_bounds = array<i64: 8, 128>}, {transform_indices = @transform_4, window_bounds = array<i64: 8, 128>}, {transform_indices = @transform_5, window_bounds = array<i64: 1, 128>}, {transform_indices = @transform_6, window_bounds = array<i64: 8, 8, 128>}]} {
    %c0 = arith.constant 0 : index
    %c0_0 = arith.constant 0 : index
    %c0_1 = arith.constant 0 : index
    %0 = vector.load %arg1[%c0, %c0_0, %c0_1] : memref<2x8x128xf32, #tpu.memory_space<vmem>>, vector<2x8x128xf32>
    %1 = tpu.iota {dimensions = array<i32: 0>} : vector<8x128xi32>
    %cst = arith.constant 0.000000e+00 : f32
    %2 = vector.broadcast %cst : f32 to vector<8x128xf32>
    %cst_2 = arith.constant 0.000000e+00 : f32
    %3 = vector.broadcast %cst_2 : f32 to vector<1x128xf32>
    %c0_3 = arith.constant 0 : index
    %c0_4 = arith.constant 0 : index
    %4 = memref.load %arg2[%c0_3, %c0_4] : memref<8x2xf32, #tpu.memory_space<smem>>
    %5 = vector.extract_strided_slice %0 {offsets = [0, 0, 0], sizes = [1, 8, 128], strides = [1, 1, 1]} : vector<2x8x128xf32> to vector<1x8x128xf32>
    %6 = vector.shape_cast %5 : vector<1x8x128xf32> to vector<8x128xf32>
    %7 = vector.broadcast %4 : f32 to vector<8x128xf32>
    %8 = arith.mulf %7, %6 : vector<8x128xf32>
    %c0_5 = arith.constant 0 : index
    %c1 = arith.constant 1 : index
    %9 = memref.load %arg2[%c0_5, %c1] : memref<8x2xf32, #tpu.memory_space<smem>>
    %10 = vector.extract_strided_slice %0 {offsets = [1, 0, 0], sizes = [1, 8, 128], strides = [1, 1, 1]} : vector<2x8x128xf32> to vector<1x8x128xf32>
    %11 = vector.shape_cast %10 : vector<1x8x128xf32> to vector<8x128xf32>
    %12 = vector.broadcast %9 : f32 to vector<8x128xf32>
    %13 = arith.mulf %12, %11 : vector<8x128xf32>
    %14 = arith.addf %8, %13 : vector<8x128xf32>
    %c0_6 = arith.constant 0 : index
    %c0_7 = arith.constant 0 : index
    %c0_8 = arith.constant 0 : index
    %15 = vector.load %arg7[%c0_6, %c0_7, %c0_8] : memref<8x8x128xf32, #tpu.memory_space<vmem>>, vector<1x8x128xf32>
    %16 = vector.shape_cast %15 : vector<1x8x128xf32> to vector<8x128xf32>
    %17 = vector.shape_cast %14 : vector<8x128xf32> to vector<1x8x128xf32>
    tpu.vector_store %arg7[%c0_6, %c0_7, %c0_8], %17 {strides = array<i32>} : memref<8x8x128xf32, #tpu.memory_space<vmem>>, vector<1x8x128xf32>,
    %18 = arith.addf %14, %2 : vector<8x128xf32>
    %cst_9 = arith.constant dense<0xFF800000> : vector<128xf32>
    %19 = vector.multi_reduction <maximumf>, %18, %cst_9 [0] : vector<8x128xf32> to vector<128xf32>
    %20 = vector.shape_cast %19 : vector<128xf32> to vector<1x128xf32>
    %21 = vector.broadcast %20 : vector<1x128xf32> to vector<8x128xf32>
    %22 = arith.subf %18, %21 : vector<8x128xf32>
    %23 = math.exp %22 : vector<8x128xf32>
    %cst_10 = arith.constant dense<0.000000e+00> : vector<128xf32>
    %24 = vector.multi_reduction <add>, %23, %cst_10 [0] : vector<8x128xf32> to vector<128xf32>
    %25 = vector.shape_cast %24 : vector<128xf32> to vector<1x128xf32>
    %26 = tpu.reciprocal %25 {approx = true} : vector<1x128xf32> -> vector<1x128xf32>
    %27 = vector.broadcast %26 : vector<1x128xf32> to vector<8x128xf32>
    %28 = arith.mulf %23, %27 : vector<8x128xf32>
    %c0_11 = arith.constant 0 : index
    %c0_12 = arith.constant 0 : index
    %c0_13 = arith.constant 0 : index
    %29 = vector.load %arg3[%c0_11, %c0_12, %c0_13] : memref<8x8x128xf32, #tpu.memory_space<vmem>>, vector<1x8x128xf32>
    %30 = vector.shape_cast %29 : vector<1x8x128xf32> to vector<8x128xf32>
    %31 = vector.shape_cast %28 : vector<8x128xf32> to vector<1x8x128xf32>
    tpu.vector_store %arg3[%c0_11, %c0_12, %c0_13], %31 {strides = array<i32>} : memref<8x8x128xf32, #tpu.memory_space<vmem>>, vector<1x8x128xf32>,
    %c0_14 = arith.constant 0 : index
    %c0_15 = arith.constant 0 : index
    %32 = vector.load %arg4[%c0_14, %c0_15] : memref<8x128xf32, #tpu.memory_space<vmem>>, vector<1x128xf32>
    tpu.vector_store %arg4[%c0_14, %c0_15], %26 {strides = array<i32>} : memref<8x128xf32, #tpu.memory_space<vmem>>, vector<1x128xf32>,
    %33 = vector.broadcast %20 : vector<1x128xf32> to vector<8x128xf32>
    %34 = arith.cmpf oge, %18, %33 : vector<8x128xf32>
    %c8_i32 = arith.constant 8 : i32
    %35 = vector.broadcast %c8_i32 : i32 to vector<8x128xi32>
    %36 = arith.select %34, %1, %35 : vector<8x128xi1>, vector<8x128xi32>
    %cst_16 = arith.constant dense<2147483647> : vector<128xi32>
    %37 = vector.multi_reduction <minsi>, %36, %cst_16 [0] : vector<8x128xi32> to vector<128xi32>
    %38 = vector.shape_cast %37 : vector<128xi32> to vector<1x128xi32>
    %c0_17 = arith.constant 0 : index
    %c0_18 = arith.constant 0 : index
    %39 = vector.load %arg5[%c0_17, %c0_18] : memref<8x128xi32, #tpu.memory_space<vmem>>, vector<1x128xi32>
    tpu.vector_store %arg5[%c0_17, %c0_18], %38 {strides = array<i32>} : memref<8x128xi32, #tpu.memory_space<vmem>>, vector<1x128xi32>,
    %40 = vector.broadcast %38 : vector<1x128xi32> to vector<8x128xi32>
    %41 = arith.cmpi eq, %1, %40 : vector<8x128xi32>
    %42 = arith.extui %41 : vector<8x128xi1> to vector<8x128xi32>
    %43 = arith.sitofp %42 : vector<8x128xi32> to vector<8x128xf32>
    %cst_19 = arith.constant -1.000000e+09 : f32
    %44 = vector.broadcast %cst_19 : f32 to vector<8x128xf32>
    %45 = arith.mulf %43, %44 : vector<8x128xf32>
    %46 = arith.addf %2, %45 : vector<8x128xf32>
    %47 = vector.extract_strided_slice %0 {offsets = [0, 0, 0], sizes = [1, 8, 128], strides = [1, 1, 1]} : vector<2x8x128xf32> to vector<1x8x128xf32>
    %48 = vector.shape_cast %47 : vector<1x8x128xf32> to vector<8x128xf32>
    %49 = arith.mulf %43, %48 : vector<8x128xf32>
    %cst_20 = arith.constant dense<0.000000e+00> : vector<128xf32>
    %50 = vector.multi_reduction <add>, %49, %cst_20 [0] : vector<8x128xf32> to vector<128xf32>
    %51 = vector.shape_cast %50 : vector<128xf32> to vector<1x128xf32>
    %52 = vector.extract_strided_slice %0 {offsets = [1, 0, 0], sizes = [1, 8, 128], strides = [1, 1, 1]} : vector<2x8x128xf32> to vector<1x8x128xf32>
    %53 = vector.shape_cast %52 : vector<1x8x128xf32> to vector<8x128xf32>
    %54 = arith.mulf %43, %53 : vector<8x128xf32>
    %cst_21 = arith.constant dense<0.000000e+00> : vector<128xf32>
    %55 = vector.multi_reduction <add>, %54, %cst_21 [0] : vector<8x128xf32> to vector<128xf32>
    %56 = vector.shape_cast %55 : vector<128xf32> to vector<1x128xf32>
    %c1_22 = arith.constant 1 : index
    %c0_23 = arith.constant 0 : index
    %57 = memref.load %arg2[%c1_22, %c0_23] : memref<8x2xf32, #tpu.memory_space<smem>>
    %58 = vector.extract_strided_slice %0 {offsets = [0, 0, 0], sizes = [1, 8, 128], strides = [1, 1, 1]} : vector<2x8x128xf32> to vector<1x8x128xf32>
    %59 = vector.shape_cast %58 : vector<1x8x128xf32> to vector<8x128xf32>
    %60 = vector.broadcast %57 : f32 to vector<8x128xf32>
    %61 = arith.mulf %60, %59 : vector<8x128xf32>
    %c1_24 = arith.constant 1 : index
    %c1_25 = arith.constant 1 : index
    %62 = memref.load %arg2[%c1_24, %c1_25] : memref<8x2xf32, #tpu.memory_space<smem>>
    %63 = vector.extract_strided_slice %0 {offsets = [1, 0, 0], sizes = [1, 8, 128], strides = [1, 1, 1]} : vector<2x8x128xf32> to vector<1x8x128xf32>
    %64 = vector.shape_cast %63 : vector<1x8x128xf32> to vector<8x128xf32>
    %65 = vector.broadcast %62 : f32 to vector<8x128xf32>
    %66 = arith.mulf %65, %64 : vector<8x128xf32>
    %67 = arith.addf %61, %66 : vector<8x128xf32>
    %c1_26 = arith.constant 1 : index
    %c0_27 = arith.constant 0 : index
    %c0_28 = arith.constant 0 : index
    %68 = vector.load %arg7[%c1_26, %c0_27, %c0_28] : memref<8x8x128xf32, #tpu.memory_space<vmem>>, vector<1x8x128xf32>
    %69 = vector.shape_cast %68 : vector<1x8x128xf32> to vector<8x128xf32>
    %70 = vector.shape_cast %67 : vector<8x128xf32> to vector<1x8x128xf32>
    tpu.vector_store %arg7[%c1_26, %c0_27, %c0_28], %70 {strides = array<i32>} : memref<8x8x128xf32, #tpu.memory_space<vmem>>, vector<1x8x128xf32>,
    %71 = arith.addf %67, %46 : vector<8x128xf32>
    %cst_29 = arith.constant dense<0xFF800000> : vector<128xf32>
    %72 = vector.multi_reduction <maximumf>, %71, %cst_29 [0] : vector<8x128xf32> to vector<128xf32>
    %73 = vector.shape_cast %72 : vector<128xf32> to vector<1x128xf32>
    %74 = vector.broadcast %73 : vector<1x128xf32> to vector<8x128xf32>
    %75 = arith.subf %71, %74 : vector<8x128xf32>
    %76 = math.exp %75 : vector<8x128xf32>
    %cst_30 = arith.constant dense<0.000000e+00> : vector<128xf32>
    %77 = vector.multi_reduction <add>, %76, %cst_30 [0] : vector<8x128xf32> to vector<128xf32>
    %78 = vector.shape_cast %77 : vector<128xf32> to vector<1x128xf32>
    %79 = tpu.reciprocal %78 {approx = true} : vector<1x128xf32> -> vector<1x128xf32>
    %80 = vector.broadcast %79 : vector<1x128xf32> to vector<8x128xf32>
    %81 = arith.mulf %76, %80 : vector<8x128xf32>
    %c1_31 = arith.constant 1 : index
    %c0_32 = arith.constant 0 : index
    %c0_33 = arith.constant 0 : index
    %82 = vector.load %arg3[%c1_31, %c0_32, %c0_33] : memref<8x8x128xf32, #tpu.memory_space<vmem>>, vector<1x8x128xf32>
    %83 = vector.shape_cast %82 : vector<1x8x128xf32> to vector<8x128xf32>
    %84 = vector.shape_cast %81 : vector<8x128xf32> to vector<1x8x128xf32>
    tpu.vector_store %arg3[%c1_31, %c0_32, %c0_33], %84 {strides = array<i32>} : memref<8x8x128xf32, #tpu.memory_space<vmem>>, vector<1x8x128xf32>,
    %c1_34 = arith.constant 1 : index
    %c0_35 = arith.constant 0 : index
    %85 = vector.load %arg4[%c1_34, %c0_35] : memref<8x128xf32, #tpu.memory_space<vmem>>, vector<1x128xf32>
    tpu.vector_store %arg4[%c1_34, %c0_35], %79 {strides = array<i32>} : memref<8x128xf32, #tpu.memory_space<vmem>>, vector<1x128xf32>,
    %86 = vector.broadcast %73 : vector<1x128xf32> to vector<8x128xf32>
    %87 = arith.cmpf oge, %71, %86 : vector<8x128xf32>
    %c8_i32_36 = arith.constant 8 : i32
    %88 = vector.broadcast %c8_i32_36 : i32 to vector<8x128xi32>
    %89 = arith.select %87, %1, %88 : vector<8x128xi1>, vector<8x128xi32>
    %cst_37 = arith.constant dense<2147483647> : vector<128xi32>
    %90 = vector.multi_reduction <minsi>, %89, %cst_37 [0] : vector<8x128xi32> to vector<128xi32>
    %91 = vector.shape_cast %90 : vector<128xi32> to vector<1x128xi32>
    %c1_38 = arith.constant 1 : index
    %c0_39 = arith.constant 0 : index
    %92 = vector.load %arg5[%c1_38, %c0_39] : memref<8x128xi32, #tpu.memory_space<vmem>>, vector<1x128xi32>
    tpu.vector_store %arg5[%c1_38, %c0_39], %91 {strides = array<i32>} : memref<8x128xi32, #tpu.memory_space<vmem>>, vector<1x128xi32>,
    %93 = vector.broadcast %91 : vector<1x128xi32> to vector<8x128xi32>
    %94 = arith.cmpi eq, %1, %93 : vector<8x128xi32>
    %95 = arith.extui %94 : vector<8x128xi1> to vector<8x128xi32>
    %96 = arith.sitofp %95 : vector<8x128xi32> to vector<8x128xf32>
    %cst_40 = arith.constant -1.000000e+09 : f32
    %97 = vector.broadcast %cst_40 : f32 to vector<8x128xf32>
    %98 = arith.mulf %96, %97 : vector<8x128xf32>
    %99 = arith.addf %46, %98 : vector<8x128xf32>
    %100 = vector.extract_strided_slice %0 {offsets = [0, 0, 0], sizes = [1, 8, 128], strides = [1, 1, 1]} : vector<2x8x128xf32> to vector<1x8x128xf32>
    %101 = vector.shape_cast %100 : vector<1x8x128xf32> to vector<8x128xf32>
    %102 = arith.mulf %96, %101 : vector<8x128xf32>
    %cst_41 = arith.constant dense<0.000000e+00> : vector<128xf32>
    %103 = vector.multi_reduction <add>, %102, %cst_41 [0] : vector<8x128xf32> to vector<128xf32>
    %104 = vector.shape_cast %103 : vector<128xf32> to vector<1x128xf32>
    %105 = vector.extract_strided_slice %0 {offsets = [1, 0, 0], sizes = [1, 8, 128], strides = [1, 1, 1]} : vector<2x8x128xf32> to vector<1x8x128xf32>
    %106 = vector.shape_cast %105 : vector<1x8x128xf32> to vector<8x128xf32>
    %107 = arith.mulf %96, %106 : vector<8x128xf32>
    %cst_42 = arith.constant dense<0.000000e+00> : vector<128xf32>
    %108 = vector.multi_reduction <add>, %107, %cst_42 [0] : vector<8x128xf32> to vector<128xf32>
    %109 = vector.shape_cast %108 : vector<128xf32> to vector<1x128xf32>
    %110 = arith.subf %104, %51 : vector<1x128xf32>
    %111 = arith.mulf %110, %110 : vector<1x128xf32>
    %112 = arith.subf %109, %56 : vector<1x128xf32>
    %113 = arith.mulf %112, %112 : vector<1x128xf32>
    %114 = arith.addf %111, %113 : vector<1x128xf32>
    %115 = math.sqrt %114 : vector<1x128xf32>
    %116 = arith.addf %3, %115 : vector<1x128xf32>
    %c2 = arith.constant 2 : index
    %c0_43 = arith.constant 0 : index
    %117 = memref.load %arg2[%c2, %c0_43] : memref<8x2xf32, #tpu.memory_space<smem>>
    %118 = vector.extract_strided_slice %0 {offsets = [0, 0, 0], sizes = [1, 8, 128], strides = [1, 1, 1]} : vector<2x8x128xf32> to vector<1x8x128xf32>
    %119 = vector.shape_cast %118 : vector<1x8x128xf32> to vector<8x128xf32>
    %120 = vector.broadcast %117 : f32 to vector<8x128xf32>
    %121 = arith.mulf %120, %119 : vector<8x128xf32>
    %c2_44 = arith.constant 2 : index
    %c1_45 = arith.constant 1 : index
    %122 = memref.load %arg2[%c2_44, %c1_45] : memref<8x2xf32, #tpu.memory_space<smem>>
    %123 = vector.extract_strided_slice %0 {offsets = [1, 0, 0], sizes = [1, 8, 128], strides = [1, 1, 1]} : vector<2x8x128xf32> to vector<1x8x128xf32>
    %124 = vector.shape_cast %123 : vector<1x8x128xf32> to vector<8x128xf32>
    %125 = vector.broadcast %122 : f32 to vector<8x128xf32>
    %126 = arith.mulf %125, %124 : vector<8x128xf32>
    %127 = arith.addf %121, %126 : vector<8x128xf32>
    %c2_46 = arith.constant 2 : index
    %c0_47 = arith.constant 0 : index
    %c0_48 = arith.constant 0 : index
    %128 = vector.load %arg7[%c2_46, %c0_47, %c0_48] : memref<8x8x128xf32, #tpu.memory_space<vmem>>, vector<1x8x128xf32>
    %129 = vector.shape_cast %128 : vector<1x8x128xf32> to vector<8x128xf32>
    %130 = vector.shape_cast %127 : vector<8x128xf32> to vector<1x8x128xf32>
    tpu.vector_store %arg7[%c2_46, %c0_47, %c0_48], %130 {strides = array<i32>} : memref<8x8x128xf32, #tpu.memory_space<vmem>>, vector<1x8x128xf32>,
    %131 = arith.addf %127, %99 : vector<8x128xf32>
    %cst_49 = arith.constant dense<0xFF800000> : vector<128xf32>
    %132 = vector.multi_reduction <maximumf>, %131, %cst_49 [0] : vector<8x128xf32> to vector<128xf32>
    %133 = vector.shape_cast %132 : vector<128xf32> to vector<1x128xf32>
    %134 = vector.broadcast %133 : vector<1x128xf32> to vector<8x128xf32>
    %135 = arith.subf %131, %134 : vector<8x128xf32>
    %136 = math.exp %135 : vector<8x128xf32>
    %cst_50 = arith.constant dense<0.000000e+00> : vector<128xf32>
    %137 = vector.multi_reduction <add>, %136, %cst_50 [0] : vector<8x128xf32> to vector<128xf32>
    %138 = vector.shape_cast %137 : vector<128xf32> to vector<1x128xf32>
    %139 = tpu.reciprocal %138 {approx = true} : vector<1x128xf32> -> vector<1x128xf32>
    %140 = vector.broadcast %139 : vector<1x128xf32> to vector<8x128xf32>
    %141 = arith.mulf %136, %140 : vector<8x128xf32>
    %c2_51 = arith.constant 2 : index
    %c0_52 = arith.constant 0 : index
    %c0_53 = arith.constant 0 : index
    %142 = vector.load %arg3[%c2_51, %c0_52, %c0_53] : memref<8x8x128xf32, #tpu.memory_space<vmem>>, vector<1x8x128xf32>
    %143 = vector.shape_cast %142 : vector<1x8x128xf32> to vector<8x128xf32>
    %144 = vector.shape_cast %141 : vector<8x128xf32> to vector<1x8x128xf32>
    tpu.vector_store %arg3[%c2_51, %c0_52, %c0_53], %144 {strides = array<i32>} : memref<8x8x128xf32, #tpu.memory_space<vmem>>, vector<1x8x128xf32>,
    %c2_54 = arith.constant 2 : index
    %c0_55 = arith.constant 0 : index
    %145 = vector.load %arg4[%c2_54, %c0_55] : memref<8x128xf32, #tpu.memory_space<vmem>>, vector<1x128xf32>
    tpu.vector_store %arg4[%c2_54, %c0_55], %139 {strides = array<i32>} : memref<8x128xf32, #tpu.memory_space<vmem>>, vector<1x128xf32>,
    %146 = vector.broadcast %133 : vector<1x128xf32> to vector<8x128xf32>
    %147 = arith.cmpf oge, %131, %146 : vector<8x128xf32>
    %c8_i32_56 = arith.constant 8 : i32
    %148 = vector.broadcast %c8_i32_56 : i32 to vector<8x128xi32>
    %149 = arith.select %147, %1, %148 : vector<8x128xi1>, vector<8x128xi32>
    %cst_57 = arith.constant dense<2147483647> : vector<128xi32>
    %150 = vector.multi_reduction <minsi>, %149, %cst_57 [0] : vector<8x128xi32> to vector<128xi32>
    %151 = vector.shape_cast %150 : vector<128xi32> to vector<1x128xi32>
    %c2_58 = arith.constant 2 : index
    %c0_59 = arith.constant 0 : index
    %152 = vector.load %arg5[%c2_58, %c0_59] : memref<8x128xi32, #tpu.memory_space<vmem>>, vector<1x128xi32>
    tpu.vector_store %arg5[%c2_58, %c0_59], %151 {strides = array<i32>} : memref<8x128xi32, #tpu.memory_space<vmem>>, vector<1x128xi32>,
    %153 = vector.broadcast %151 : vector<1x128xi32> to vector<8x128xi32>
    %154 = arith.cmpi eq, %1, %153 : vector<8x128xi32>
    %155 = arith.extui %154 : vector<8x128xi1> to vector<8x128xi32>
    %156 = arith.sitofp %155 : vector<8x128xi32> to vector<8x128xf32>
    %cst_60 = arith.constant -1.000000e+09 : f32
    %157 = vector.broadcast %cst_60 : f32 to vector<8x128xf32>
    %158 = arith.mulf %156, %157 : vector<8x128xf32>
    %159 = arith.addf %99, %158 : vector<8x128xf32>
    %160 = vector.extract_strided_slice %0 {offsets = [0, 0, 0], sizes = [1, 8, 128], strides = [1, 1, 1]} : vector<2x8x128xf32> to vector<1x8x128xf32>
    %161 = vector.shape_cast %160 : vector<1x8x128xf32> to vector<8x128xf32>
    %162 = arith.mulf %156, %161 : vector<8x128xf32>
    %cst_61 = arith.constant dense<0.000000e+00> : vector<128xf32>
    %163 = vector.multi_reduction <add>, %162, %cst_61 [0] : vector<8x128xf32> to vector<128xf32>
    %164 = vector.shape_cast %163 : vector<128xf32> to vector<1x128xf32>
    %165 = vector.extract_strided_slice %0 {offsets = [1, 0, 0], sizes = [1, 8, 128], strides = [1, 1, 1]} : vector<2x8x128xf32> to vector<1x8x128xf32>
    %166 = vector.shape_cast %165 : vector<1x8x128xf32> to vector<8x128xf32>
    %167 = arith.mulf %156, %166 : vector<8x128xf32>
    %cst_62 = arith.constant dense<0.000000e+00> : vector<128xf32>
    %168 = vector.multi_reduction <add>, %167, %cst_62 [0] : vector<8x128xf32> to vector<128xf32>
    %169 = vector.shape_cast %168 : vector<128xf32> to vector<1x128xf32>
    %170 = arith.subf %164, %104 : vector<1x128xf32>
    %171 = arith.mulf %170, %170 : vector<1x128xf32>
    %172 = arith.subf %169, %109 : vector<1x128xf32>
    %173 = arith.mulf %172, %172 : vector<1x128xf32>
    %174 = arith.addf %171, %173 : vector<1x128xf32>
    %175 = math.sqrt %174 : vector<1x128xf32>
    %176 = arith.addf %116, %175 : vector<1x128xf32>
    %c3 = arith.constant 3 : index
    %c0_63 = arith.constant 0 : index
    %177 = memref.load %arg2[%c3, %c0_63] : memref<8x2xf32, #tpu.memory_space<smem>>
    %178 = vector.extract_strided_slice %0 {offsets = [0, 0, 0], sizes = [1, 8, 128], strides = [1, 1, 1]} : vector<2x8x128xf32> to vector<1x8x128xf32>
    %179 = vector.shape_cast %178 : vector<1x8x128xf32> to vector<8x128xf32>
    %180 = vector.broadcast %177 : f32 to vector<8x128xf32>
    %181 = arith.mulf %180, %179 : vector<8x128xf32>
    %c3_64 = arith.constant 3 : index
    %c1_65 = arith.constant 1 : index
    %182 = memref.load %arg2[%c3_64, %c1_65] : memref<8x2xf32, #tpu.memory_space<smem>>
    %183 = vector.extract_strided_slice %0 {offsets = [1, 0, 0], sizes = [1, 8, 128], strides = [1, 1, 1]} : vector<2x8x128xf32> to vector<1x8x128xf32>
    %184 = vector.shape_cast %183 : vector<1x8x128xf32> to vector<8x128xf32>
    %185 = vector.broadcast %182 : f32 to vector<8x128xf32>
    %186 = arith.mulf %185, %184 : vector<8x128xf32>
    %187 = arith.addf %181, %186 : vector<8x128xf32>
    %c3_66 = arith.constant 3 : index
    %c0_67 = arith.constant 0 : index
    %c0_68 = arith.constant 0 : index
    %188 = vector.load %arg7[%c3_66, %c0_67, %c0_68] : memref<8x8x128xf32, #tpu.memory_space<vmem>>, vector<1x8x128xf32>
    %189 = vector.shape_cast %188 : vector<1x8x128xf32> to vector<8x128xf32>
    %190 = vector.shape_cast %187 : vector<8x128xf32> to vector<1x8x128xf32>
    tpu.vector_store %arg7[%c3_66, %c0_67, %c0_68], %190 {strides = array<i32>} : memref<8x8x128xf32, #tpu.memory_space<vmem>>, vector<1x8x128xf32>,
    %191 = arith.addf %187, %159 : vector<8x128xf32>
    %cst_69 = arith.constant dense<0xFF800000> : vector<128xf32>
    %192 = vector.multi_reduction <maximumf>, %191, %cst_69 [0] : vector<8x128xf32> to vector<128xf32>
    %193 = vector.shape_cast %192 : vector<128xf32> to vector<1x128xf32>
    %194 = vector.broadcast %193 : vector<1x128xf32> to vector<8x128xf32>
    %195 = arith.subf %191, %194 : vector<8x128xf32>
    %196 = math.exp %195 : vector<8x128xf32>
    %cst_70 = arith.constant dense<0.000000e+00> : vector<128xf32>
    %197 = vector.multi_reduction <add>, %196, %cst_70 [0] : vector<8x128xf32> to vector<128xf32>
    %198 = vector.shape_cast %197 : vector<128xf32> to vector<1x128xf32>
    %199 = tpu.reciprocal %198 {approx = true} : vector<1x128xf32> -> vector<1x128xf32>
    %200 = vector.broadcast %199 : vector<1x128xf32> to vector<8x128xf32>
    %201 = arith.mulf %196, %200 : vector<8x128xf32>
    %c3_71 = arith.constant 3 : index
    %c0_72 = arith.constant 0 : index
    %c0_73 = arith.constant 0 : index
    %202 = vector.load %arg3[%c3_71, %c0_72, %c0_73] : memref<8x8x128xf32, #tpu.memory_space<vmem>>, vector<1x8x128xf32>
    %203 = vector.shape_cast %202 : vector<1x8x128xf32> to vector<8x128xf32>
    %204 = vector.shape_cast %201 : vector<8x128xf32> to vector<1x8x128xf32>
    tpu.vector_store %arg3[%c3_71, %c0_72, %c0_73], %204 {strides = array<i32>} : memref<8x8x128xf32, #tpu.memory_space<vmem>>, vector<1x8x128xf32>,
    %c3_74 = arith.constant 3 : index
    %c0_75 = arith.constant 0 : index
    %205 = vector.load %arg4[%c3_74, %c0_75] : memref<8x128xf32, #tpu.memory_space<vmem>>, vector<1x128xf32>
    tpu.vector_store %arg4[%c3_74, %c0_75], %199 {strides = array<i32>} : memref<8x128xf32, #tpu.memory_space<vmem>>, vector<1x128xf32>,
    %206 = vector.broadcast %193 : vector<1x128xf32> to vector<8x128xf32>
    %207 = arith.cmpf oge, %191, %206 : vector<8x128xf32>
    %c8_i32_76 = arith.constant 8 : i32
    %208 = vector.broadcast %c8_i32_76 : i32 to vector<8x128xi32>
    %209 = arith.select %207, %1, %208 : vector<8x128xi1>, vector<8x128xi32>
    %cst_77 = arith.constant dense<2147483647> : vector<128xi32>
    %210 = vector.multi_reduction <minsi>, %209, %cst_77 [0] : vector<8x128xi32> to vector<128xi32>
    %211 = vector.shape_cast %210 : vector<128xi32> to vector<1x128xi32>
    %c3_78 = arith.constant 3 : index
    %c0_79 = arith.constant 0 : index
    %212 = vector.load %arg5[%c3_78, %c0_79] : memref<8x128xi32, #tpu.memory_space<vmem>>, vector<1x128xi32>
    tpu.vector_store %arg5[%c3_78, %c0_79], %211 {strides = array<i32>} : memref<8x128xi32, #tpu.memory_space<vmem>>, vector<1x128xi32>,
    %213 = vector.broadcast %211 : vector<1x128xi32> to vector<8x128xi32>
    %214 = arith.cmpi eq, %1, %213 : vector<8x128xi32>
    %215 = arith.extui %214 : vector<8x128xi1> to vector<8x128xi32>
    %216 = arith.sitofp %215 : vector<8x128xi32> to vector<8x128xf32>
    %cst_80 = arith.constant -1.000000e+09 : f32
    %217 = vector.broadcast %cst_80 : f32 to vector<8x128xf32>
    %218 = arith.mulf %216, %217 : vector<8x128xf32>
    %219 = arith.addf %159, %218 : vector<8x128xf32>
    %220 = vector.extract_strided_slice %0 {offsets = [0, 0, 0], sizes = [1, 8, 128], strides = [1, 1, 1]} : vector<2x8x128xf32> to vector<1x8x128xf32>
    %221 = vector.shape_cast %220 : vector<1x8x128xf32> to vector<8x128xf32>
    %222 = arith.mulf %216, %221 : vector<8x128xf32>
    %cst_81 = arith.constant dense<0.000000e+00> : vector<128xf32>
    %223 = vector.multi_reduction <add>, %222, %cst_81 [0] : vector<8x128xf32> to vector<128xf32>
    %224 = vector.shape_cast %223 : vector<128xf32> to vector<1x128xf32>
    %225 = vector.extract_strided_slice %0 {offsets = [1, 0, 0], sizes = [1, 8, 128], strides = [1, 1, 1]} : vector<2x8x128xf32> to vector<1x8x128xf32>
    %226 = vector.shape_cast %225 : vector<1x8x128xf32> to vector<8x128xf32>
    %227 = arith.mulf %216, %226 : vector<8x128xf32>
    %cst_82 = arith.constant dense<0.000000e+00> : vector<128xf32>
    %228 = vector.multi_reduction <add>, %227, %cst_82 [0] : vector<8x128xf32> to vector<128xf32>
    %229 = vector.shape_cast %228 : vector<128xf32> to vector<1x128xf32>
    %230 = arith.subf %224, %164 : vector<1x128xf32>
    %231 = arith.mulf %230, %230 : vector<1x128xf32>
    %232 = arith.subf %229, %169 : vector<1x128xf32>
    %233 = arith.mulf %232, %232 : vector<1x128xf32>
    %234 = arith.addf %231, %233 : vector<1x128xf32>
    %235 = math.sqrt %234 : vector<1x128xf32>
    %236 = arith.addf %176, %235 : vector<1x128xf32>
    %c4 = arith.constant 4 : index
    %c0_83 = arith.constant 0 : index
    %237 = memref.load %arg2[%c4, %c0_83] : memref<8x2xf32, #tpu.memory_space<smem>>
    %238 = vector.extract_strided_slice %0 {offsets = [0, 0, 0], sizes = [1, 8, 128], strides = [1, 1, 1]} : vector<2x8x128xf32> to vector<1x8x128xf32>
    %239 = vector.shape_cast %238 : vector<1x8x128xf32> to vector<8x128xf32>
    %240 = vector.broadcast %237 : f32 to vector<8x128xf32>
    %241 = arith.mulf %240, %239 : vector<8x128xf32>
    %c4_84 = arith.constant 4 : index
    %c1_85 = arith.constant 1 : index
    %242 = memref.load %arg2[%c4_84, %c1_85] : memref<8x2xf32, #tpu.memory_space<smem>>
    %243 = vector.extract_strided_slice %0 {offsets = [1, 0, 0], sizes = [1, 8, 128], strides = [1, 1, 1]} : vector<2x8x128xf32> to vector<1x8x128xf32>
    %244 = vector.shape_cast %243 : vector<1x8x128xf32> to vector<8x128xf32>
    %245 = vector.broadcast %242 : f32 to vector<8x128xf32>
    %246 = arith.mulf %245, %244 : vector<8x128xf32>
    %247 = arith.addf %241, %246 : vector<8x128xf32>
    %c4_86 = arith.constant 4 : index
    %c0_87 = arith.constant 0 : index
    %c0_88 = arith.constant 0 : index
    %248 = vector.load %arg7[%c4_86, %c0_87, %c0_88] : memref<8x8x128xf32, #tpu.memory_space<vmem>>, vector<1x8x128xf32>
    %249 = vector.shape_cast %248 : vector<1x8x128xf32> to vector<8x128xf32>
    %250 = vector.shape_cast %247 : vector<8x128xf32> to vector<1x8x128xf32>
    tpu.vector_store %arg7[%c4_86, %c0_87, %c0_88], %250 {strides = array<i32>} : memref<8x8x128xf32, #tpu.memory_space<vmem>>, vector<1x8x128xf32>,
    %251 = arith.addf %247, %219 : vector<8x128xf32>
    %cst_89 = arith.constant dense<0xFF800000> : vector<128xf32>
    %252 = vector.multi_reduction <maximumf>, %251, %cst_89 [0] : vector<8x128xf32> to vector<128xf32>
    %253 = vector.shape_cast %252 : vector<128xf32> to vector<1x128xf32>
    %254 = vector.broadcast %253 : vector<1x128xf32> to vector<8x128xf32>
    %255 = arith.subf %251, %254 : vector<8x128xf32>
    %256 = math.exp %255 : vector<8x128xf32>
    %cst_90 = arith.constant dense<0.000000e+00> : vector<128xf32>
    %257 = vector.multi_reduction <add>, %256, %cst_90 [0] : vector<8x128xf32> to vector<128xf32>
    %258 = vector.shape_cast %257 : vector<128xf32> to vector<1x128xf32>
    %259 = tpu.reciprocal %258 {approx = true} : vector<1x128xf32> -> vector<1x128xf32>
    %260 = vector.broadcast %259 : vector<1x128xf32> to vector<8x128xf32>
    %261 = arith.mulf %256, %260 : vector<8x128xf32>
    %c4_91 = arith.constant 4 : index
    %c0_92 = arith.constant 0 : index
    %c0_93 = arith.constant 0 : index
    %262 = vector.load %arg3[%c4_91, %c0_92, %c0_93] : memref<8x8x128xf32, #tpu.memory_space<vmem>>, vector<1x8x128xf32>
    %263 = vector.shape_cast %262 : vector<1x8x128xf32> to vector<8x128xf32>
    %264 = vector.shape_cast %261 : vector<8x128xf32> to vector<1x8x128xf32>
    tpu.vector_store %arg3[%c4_91, %c0_92, %c0_93], %264 {strides = array<i32>} : memref<8x8x128xf32, #tpu.memory_space<vmem>>, vector<1x8x128xf32>,
    %c4_94 = arith.constant 4 : index
    %c0_95 = arith.constant 0 : index
    %265 = vector.load %arg4[%c4_94, %c0_95] : memref<8x128xf32, #tpu.memory_space<vmem>>, vector<1x128xf32>
    tpu.vector_store %arg4[%c4_94, %c0_95], %259 {strides = array<i32>} : memref<8x128xf32, #tpu.memory_space<vmem>>, vector<1x128xf32>,
    %266 = vector.broadcast %253 : vector<1x128xf32> to vector<8x128xf32>
    %267 = arith.cmpf oge, %251, %266 : vector<8x128xf32>
    %c8_i32_96 = arith.constant 8 : i32
    %268 = vector.broadcast %c8_i32_96 : i32 to vector<8x128xi32>
    %269 = arith.select %267, %1, %268 : vector<8x128xi1>, vector<8x128xi32>
    %cst_97 = arith.constant dense<2147483647> : vector<128xi32>
    %270 = vector.multi_reduction <minsi>, %269, %cst_97 [0] : vector<8x128xi32> to vector<128xi32>
    %271 = vector.shape_cast %270 : vector<128xi32> to vector<1x128xi32>
    %c4_98 = arith.constant 4 : index
    %c0_99 = arith.constant 0 : index
    %272 = vector.load %arg5[%c4_98, %c0_99] : memref<8x128xi32, #tpu.memory_space<vmem>>, vector<1x128xi32>
    tpu.vector_store %arg5[%c4_98, %c0_99], %271 {strides = array<i32>} : memref<8x128xi32, #tpu.memory_space<vmem>>, vector<1x128xi32>,
    %273 = vector.broadcast %271 : vector<1x128xi32> to vector<8x128xi32>
    %274 = arith.cmpi eq, %1, %273 : vector<8x128xi32>
    %275 = arith.extui %274 : vector<8x128xi1> to vector<8x128xi32>
    %276 = arith.sitofp %275 : vector<8x128xi32> to vector<8x128xf32>
    %cst_100 = arith.constant -1.000000e+09 : f32
    %277 = vector.broadcast %cst_100 : f32 to vector<8x128xf32>
    %278 = arith.mulf %276, %277 : vector<8x128xf32>
    %279 = arith.addf %219, %278 : vector<8x128xf32>
    %280 = vector.extract_strided_slice %0 {offsets = [0, 0, 0], sizes = [1, 8, 128], strides = [1, 1, 1]} : vector<2x8x128xf32> to vector<1x8x128xf32>
    %281 = vector.shape_cast %280 : vector<1x8x128xf32> to vector<8x128xf32>
    %282 = arith.mulf %276, %281 : vector<8x128xf32>
    %cst_101 = arith.constant dense<0.000000e+00> : vector<128xf32>
    %283 = vector.multi_reduction <add>, %282, %cst_101 [0] : vector<8x128xf32> to vector<128xf32>
    %284 = vector.shape_cast %283 : vector<128xf32> to vector<1x128xf32>
    %285 = vector.extract_strided_slice %0 {offsets = [1, 0, 0], sizes = [1, 8, 128], strides = [1, 1, 1]} : vector<2x8x128xf32> to vector<1x8x128xf32>
    %286 = vector.shape_cast %285 : vector<1x8x128xf32> to vector<8x128xf32>
    %287 = arith.mulf %276, %286 : vector<8x128xf32>
    %cst_102 = arith.constant dense<0.000000e+00> : vector<128xf32>
    %288 = vector.multi_reduction <add>, %287, %cst_102 [0] : vector<8x128xf32> to vector<128xf32>
    %289 = vector.shape_cast %288 : vector<128xf32> to vector<1x128xf32>
    %290 = arith.subf %284, %224 : vector<1x128xf32>
    %291 = arith.mulf %290, %290 : vector<1x128xf32>
    %292 = arith.subf %289, %229 : vector<1x128xf32>
    %293 = arith.mulf %292, %292 : vector<1x128xf32>
    %294 = arith.addf %291, %293 : vector<1x128xf32>
    %295 = math.sqrt %294 : vector<1x128xf32>
    %296 = arith.addf %236, %295 : vector<1x128xf32>
    %c5 = arith.constant 5 : index
    %c0_103 = arith.constant 0 : index
    %297 = memref.load %arg2[%c5, %c0_103] : memref<8x2xf32, #tpu.memory_space<smem>>
    %298 = vector.extract_strided_slice %0 {offsets = [0, 0, 0], sizes = [1, 8, 128], strides = [1, 1, 1]} : vector<2x8x128xf32> to vector<1x8x128xf32>
    %299 = vector.shape_cast %298 : vector<1x8x128xf32> to vector<8x128xf32>
    %300 = vector.broadcast %297 : f32 to vector<8x128xf32>
    %301 = arith.mulf %300, %299 : vector<8x128xf32>
    %c5_104 = arith.constant 5 : index
    %c1_105 = arith.constant 1 : index
    %302 = memref.load %arg2[%c5_104, %c1_105] : memref<8x2xf32, #tpu.memory_space<smem>>
    %303 = vector.extract_strided_slice %0 {offsets = [1, 0, 0], sizes = [1, 8, 128], strides = [1, 1, 1]} : vector<2x8x128xf32> to vector<1x8x128xf32>
    %304 = vector.shape_cast %303 : vector<1x8x128xf32> to vector<8x128xf32>
    %305 = vector.broadcast %302 : f32 to vector<8x128xf32>
    %306 = arith.mulf %305, %304 : vector<8x128xf32>
    %307 = arith.addf %301, %306 : vector<8x128xf32>
    %c5_106 = arith.constant 5 : index
    %c0_107 = arith.constant 0 : index
    %c0_108 = arith.constant 0 : index
    %308 = vector.load %arg7[%c5_106, %c0_107, %c0_108] : memref<8x8x128xf32, #tpu.memory_space<vmem>>, vector<1x8x128xf32>
    %309 = vector.shape_cast %308 : vector<1x8x128xf32> to vector<8x128xf32>
    %310 = vector.shape_cast %307 : vector<8x128xf32> to vector<1x8x128xf32>
    tpu.vector_store %arg7[%c5_106, %c0_107, %c0_108], %310 {strides = array<i32>} : memref<8x8x128xf32, #tpu.memory_space<vmem>>, vector<1x8x128xf32>,
    %311 = arith.addf %307, %279 : vector<8x128xf32>
    %cst_109 = arith.constant dense<0xFF800000> : vector<128xf32>
    %312 = vector.multi_reduction <maximumf>, %311, %cst_109 [0] : vector<8x128xf32> to vector<128xf32>
    %313 = vector.shape_cast %312 : vector<128xf32> to vector<1x128xf32>
    %314 = vector.broadcast %313 : vector<1x128xf32> to vector<8x128xf32>
    %315 = arith.subf %311, %314 : vector<8x128xf32>
    %316 = math.exp %315 : vector<8x128xf32>
    %cst_110 = arith.constant dense<0.000000e+00> : vector<128xf32>
    %317 = vector.multi_reduction <add>, %316, %cst_110 [0] : vector<8x128xf32> to vector<128xf32>
    %318 = vector.shape_cast %317 : vector<128xf32> to vector<1x128xf32>
    %319 = tpu.reciprocal %318 {approx = true} : vector<1x128xf32> -> vector<1x128xf32>
    %320 = vector.broadcast %319 : vector<1x128xf32> to vector<8x128xf32>
    %321 = arith.mulf %316, %320 : vector<8x128xf32>
    %c5_111 = arith.constant 5 : index
    %c0_112 = arith.constant 0 : index
    %c0_113 = arith.constant 0 : index
    %322 = vector.load %arg3[%c5_111, %c0_112, %c0_113] : memref<8x8x128xf32, #tpu.memory_space<vmem>>, vector<1x8x128xf32>
    %323 = vector.shape_cast %322 : vector<1x8x128xf32> to vector<8x128xf32>
    %324 = vector.shape_cast %321 : vector<8x128xf32> to vector<1x8x128xf32>
    tpu.vector_store %arg3[%c5_111, %c0_112, %c0_113], %324 {strides = array<i32>} : memref<8x8x128xf32, #tpu.memory_space<vmem>>, vector<1x8x128xf32>,
    %c5_114 = arith.constant 5 : index
    %c0_115 = arith.constant 0 : index
    %325 = vector.load %arg4[%c5_114, %c0_115] : memref<8x128xf32, #tpu.memory_space<vmem>>, vector<1x128xf32>
    tpu.vector_store %arg4[%c5_114, %c0_115], %319 {strides = array<i32>} : memref<8x128xf32, #tpu.memory_space<vmem>>, vector<1x128xf32>,
    %326 = vector.broadcast %313 : vector<1x128xf32> to vector<8x128xf32>
    %327 = arith.cmpf oge, %311, %326 : vector<8x128xf32>
    %c8_i32_116 = arith.constant 8 : i32
    %328 = vector.broadcast %c8_i32_116 : i32 to vector<8x128xi32>
    %329 = arith.select %327, %1, %328 : vector<8x128xi1>, vector<8x128xi32>
    %cst_117 = arith.constant dense<2147483647> : vector<128xi32>
    %330 = vector.multi_reduction <minsi>, %329, %cst_117 [0] : vector<8x128xi32> to vector<128xi32>
    %331 = vector.shape_cast %330 : vector<128xi32> to vector<1x128xi32>
    %c5_118 = arith.constant 5 : index
    %c0_119 = arith.constant 0 : index
    %332 = vector.load %arg5[%c5_118, %c0_119] : memref<8x128xi32, #tpu.memory_space<vmem>>, vector<1x128xi32>
    tpu.vector_store %arg5[%c5_118, %c0_119], %331 {strides = array<i32>} : memref<8x128xi32, #tpu.memory_space<vmem>>, vector<1x128xi32>,
    %333 = vector.broadcast %331 : vector<1x128xi32> to vector<8x128xi32>
    %334 = arith.cmpi eq, %1, %333 : vector<8x128xi32>
    %335 = arith.extui %334 : vector<8x128xi1> to vector<8x128xi32>
    %336 = arith.sitofp %335 : vector<8x128xi32> to vector<8x128xf32>
    %cst_120 = arith.constant -1.000000e+09 : f32
    %337 = vector.broadcast %cst_120 : f32 to vector<8x128xf32>
    %338 = arith.mulf %336, %337 : vector<8x128xf32>
    %339 = arith.addf %279, %338 : vector<8x128xf32>
    %340 = vector.extract_strided_slice %0 {offsets = [0, 0, 0], sizes = [1, 8, 128], strides = [1, 1, 1]} : vector<2x8x128xf32> to vector<1x8x128xf32>
    %341 = vector.shape_cast %340 : vector<1x8x128xf32> to vector<8x128xf32>
    %342 = arith.mulf %336, %341 : vector<8x128xf32>
    %cst_121 = arith.constant dense<0.000000e+00> : vector<128xf32>
    %343 = vector.multi_reduction <add>, %342, %cst_121 [0] : vector<8x128xf32> to vector<128xf32>
    %344 = vector.shape_cast %343 : vector<128xf32> to vector<1x128xf32>
    %345 = vector.extract_strided_slice %0 {offsets = [1, 0, 0], sizes = [1, 8, 128], strides = [1, 1, 1]} : vector<2x8x128xf32> to vector<1x8x128xf32>
    %346 = vector.shape_cast %345 : vector<1x8x128xf32> to vector<8x128xf32>
    %347 = arith.mulf %336, %346 : vector<8x128xf32>
    %cst_122 = arith.constant dense<0.000000e+00> : vector<128xf32>
    %348 = vector.multi_reduction <add>, %347, %cst_122 [0] : vector<8x128xf32> to vector<128xf32>
    %349 = vector.shape_cast %348 : vector<128xf32> to vector<1x128xf32>
    %350 = arith.subf %344, %284 : vector<1x128xf32>
    %351 = arith.mulf %350, %350 : vector<1x128xf32>
    %352 = arith.subf %349, %289 : vector<1x128xf32>
    %353 = arith.mulf %352, %352 : vector<1x128xf32>
    %354 = arith.addf %351, %353 : vector<1x128xf32>
    %355 = math.sqrt %354 : vector<1x128xf32>
    %356 = arith.addf %296, %355 : vector<1x128xf32>
    %c6 = arith.constant 6 : index
    %c0_123 = arith.constant 0 : index
    %357 = memref.load %arg2[%c6, %c0_123] : memref<8x2xf32, #tpu.memory_space<smem>>
    %358 = vector.extract_strided_slice %0 {offsets = [0, 0, 0], sizes = [1, 8, 128], strides = [1, 1, 1]} : vector<2x8x128xf32> to vector<1x8x128xf32>
    %359 = vector.shape_cast %358 : vector<1x8x128xf32> to vector<8x128xf32>
    %360 = vector.broadcast %357 : f32 to vector<8x128xf32>
    %361 = arith.mulf %360, %359 : vector<8x128xf32>
    %c6_124 = arith.constant 6 : index
    %c1_125 = arith.constant 1 : index
    %362 = memref.load %arg2[%c6_124, %c1_125] : memref<8x2xf32, #tpu.memory_space<smem>>
    %363 = vector.extract_strided_slice %0 {offsets = [1, 0, 0], sizes = [1, 8, 128], strides = [1, 1, 1]} : vector<2x8x128xf32> to vector<1x8x128xf32>
    %364 = vector.shape_cast %363 : vector<1x8x128xf32> to vector<8x128xf32>
    %365 = vector.broadcast %362 : f32 to vector<8x128xf32>
    %366 = arith.mulf %365, %364 : vector<8x128xf32>
    %367 = arith.addf %361, %366 : vector<8x128xf32>
    %c6_126 = arith.constant 6 : index
    %c0_127 = arith.constant 0 : index
    %c0_128 = arith.constant 0 : index
    %368 = vector.load %arg7[%c6_126, %c0_127, %c0_128] : memref<8x8x128xf32, #tpu.memory_space<vmem>>, vector<1x8x128xf32>
    %369 = vector.shape_cast %368 : vector<1x8x128xf32> to vector<8x128xf32>
    %370 = vector.shape_cast %367 : vector<8x128xf32> to vector<1x8x128xf32>
    tpu.vector_store %arg7[%c6_126, %c0_127, %c0_128], %370 {strides = array<i32>} : memref<8x8x128xf32, #tpu.memory_space<vmem>>, vector<1x8x128xf32>,
    %371 = arith.addf %367, %339 : vector<8x128xf32>
    %cst_129 = arith.constant dense<0xFF800000> : vector<128xf32>
    %372 = vector.multi_reduction <maximumf>, %371, %cst_129 [0] : vector<8x128xf32> to vector<128xf32>
    %373 = vector.shape_cast %372 : vector<128xf32> to vector<1x128xf32>
    %374 = vector.broadcast %373 : vector<1x128xf32> to vector<8x128xf32>
    %375 = arith.subf %371, %374 : vector<8x128xf32>
    %376 = math.exp %375 : vector<8x128xf32>
    %cst_130 = arith.constant dense<0.000000e+00> : vector<128xf32>
    %377 = vector.multi_reduction <add>, %376, %cst_130 [0] : vector<8x128xf32> to vector<128xf32>
    %378 = vector.shape_cast %377 : vector<128xf32> to vector<1x128xf32>
    %379 = tpu.reciprocal %378 {approx = true} : vector<1x128xf32> -> vector<1x128xf32>
    %380 = vector.broadcast %379 : vector<1x128xf32> to vector<8x128xf32>
    %381 = arith.mulf %376, %380 : vector<8x128xf32>
    %c6_131 = arith.constant 6 : index
    %c0_132 = arith.constant 0 : index
    %c0_133 = arith.constant 0 : index
    %382 = vector.load %arg3[%c6_131, %c0_132, %c0_133] : memref<8x8x128xf32, #tpu.memory_space<vmem>>, vector<1x8x128xf32>
    %383 = vector.shape_cast %382 : vector<1x8x128xf32> to vector<8x128xf32>
    %384 = vector.shape_cast %381 : vector<8x128xf32> to vector<1x8x128xf32>
    tpu.vector_store %arg3[%c6_131, %c0_132, %c0_133], %384 {strides = array<i32>} : memref<8x8x128xf32, #tpu.memory_space<vmem>>, vector<1x8x128xf32>,
    %c6_134 = arith.constant 6 : index
    %c0_135 = arith.constant 0 : index
    %385 = vector.load %arg4[%c6_134, %c0_135] : memref<8x128xf32, #tpu.memory_space<vmem>>, vector<1x128xf32>
    tpu.vector_store %arg4[%c6_134, %c0_135], %379 {strides = array<i32>} : memref<8x128xf32, #tpu.memory_space<vmem>>, vector<1x128xf32>,
    %386 = vector.broadcast %373 : vector<1x128xf32> to vector<8x128xf32>
    %387 = arith.cmpf oge, %371, %386 : vector<8x128xf32>
    %c8_i32_136 = arith.constant 8 : i32
    %388 = vector.broadcast %c8_i32_136 : i32 to vector<8x128xi32>
    %389 = arith.select %387, %1, %388 : vector<8x128xi1>, vector<8x128xi32>
    %cst_137 = arith.constant dense<2147483647> : vector<128xi32>
    %390 = vector.multi_reduction <minsi>, %389, %cst_137 [0] : vector<8x128xi32> to vector<128xi32>
    %391 = vector.shape_cast %390 : vector<128xi32> to vector<1x128xi32>
    %c6_138 = arith.constant 6 : index
    %c0_139 = arith.constant 0 : index
    %392 = vector.load %arg5[%c6_138, %c0_139] : memref<8x128xi32, #tpu.memory_space<vmem>>, vector<1x128xi32>
    tpu.vector_store %arg5[%c6_138, %c0_139], %391 {strides = array<i32>} : memref<8x128xi32, #tpu.memory_space<vmem>>, vector<1x128xi32>,
    %393 = vector.broadcast %391 : vector<1x128xi32> to vector<8x128xi32>
    %394 = arith.cmpi eq, %1, %393 : vector<8x128xi32>
    %395 = arith.extui %394 : vector<8x128xi1> to vector<8x128xi32>
    %396 = arith.sitofp %395 : vector<8x128xi32> to vector<8x128xf32>
    %cst_140 = arith.constant -1.000000e+09 : f32
    %397 = vector.broadcast %cst_140 : f32 to vector<8x128xf32>
    %398 = arith.mulf %396, %397 : vector<8x128xf32>
    %399 = arith.addf %339, %398 : vector<8x128xf32>
    %400 = vector.extract_strided_slice %0 {offsets = [0, 0, 0], sizes = [1, 8, 128], strides = [1, 1, 1]} : vector<2x8x128xf32> to vector<1x8x128xf32>
    %401 = vector.shape_cast %400 : vector<1x8x128xf32> to vector<8x128xf32>
    %402 = arith.mulf %396, %401 : vector<8x128xf32>
    %cst_141 = arith.constant dense<0.000000e+00> : vector<128xf32>
    %403 = vector.multi_reduction <add>, %402, %cst_141 [0] : vector<8x128xf32> to vector<128xf32>
    %404 = vector.shape_cast %403 : vector<128xf32> to vector<1x128xf32>
    %405 = vector.extract_strided_slice %0 {offsets = [1, 0, 0], sizes = [1, 8, 128], strides = [1, 1, 1]} : vector<2x8x128xf32> to vector<1x8x128xf32>
    %406 = vector.shape_cast %405 : vector<1x8x128xf32> to vector<8x128xf32>
    %407 = arith.mulf %396, %406 : vector<8x128xf32>
    %cst_142 = arith.constant dense<0.000000e+00> : vector<128xf32>
    %408 = vector.multi_reduction <add>, %407, %cst_142 [0] : vector<8x128xf32> to vector<128xf32>
    %409 = vector.shape_cast %408 : vector<128xf32> to vector<1x128xf32>
    %410 = arith.subf %404, %344 : vector<1x128xf32>
    %411 = arith.mulf %410, %410 : vector<1x128xf32>
    %412 = arith.subf %409, %349 : vector<1x128xf32>
    %413 = arith.mulf %412, %412 : vector<1x128xf32>
    %414 = arith.addf %411, %413 : vector<1x128xf32>
    %415 = math.sqrt %414 : vector<1x128xf32>
    %416 = arith.addf %356, %415 : vector<1x128xf32>
    %c7 = arith.constant 7 : index
    %c0_143 = arith.constant 0 : index
    %417 = memref.load %arg2[%c7, %c0_143] : memref<8x2xf32, #tpu.memory_space<smem>>
    %418 = vector.extract_strided_slice %0 {offsets = [0, 0, 0], sizes = [1, 8, 128], strides = [1, 1, 1]} : vector<2x8x128xf32> to vector<1x8x128xf32>
    %419 = vector.shape_cast %418 : vector<1x8x128xf32> to vector<8x128xf32>
    %420 = vector.broadcast %417 : f32 to vector<8x128xf32>
    %421 = arith.mulf %420, %419 : vector<8x128xf32>
    %c7_144 = arith.constant 7 : index
    %c1_145 = arith.constant 1 : index
    %422 = memref.load %arg2[%c7_144, %c1_145] : memref<8x2xf32, #tpu.memory_space<smem>>
    %423 = vector.extract_strided_slice %0 {offsets = [1, 0, 0], sizes = [1, 8, 128], strides = [1, 1, 1]} : vector<2x8x128xf32> to vector<1x8x128xf32>
    %424 = vector.shape_cast %423 : vector<1x8x128xf32> to vector<8x128xf32>
    %425 = vector.broadcast %422 : f32 to vector<8x128xf32>
    %426 = arith.mulf %425, %424 : vector<8x128xf32>
    %427 = arith.addf %421, %426 : vector<8x128xf32>
    %c7_146 = arith.constant 7 : index
    %c0_147 = arith.constant 0 : index
    %c0_148 = arith.constant 0 : index
    %428 = vector.load %arg7[%c7_146, %c0_147, %c0_148] : memref<8x8x128xf32, #tpu.memory_space<vmem>>, vector<1x8x128xf32>
    %429 = vector.shape_cast %428 : vector<1x8x128xf32> to vector<8x128xf32>
    %430 = vector.shape_cast %427 : vector<8x128xf32> to vector<1x8x128xf32>
    tpu.vector_store %arg7[%c7_146, %c0_147, %c0_148], %430 {strides = array<i32>} : memref<8x8x128xf32, #tpu.memory_space<vmem>>, vector<1x8x128xf32>,
    %431 = arith.addf %427, %399 : vector<8x128xf32>
    %cst_149 = arith.constant dense<0xFF800000> : vector<128xf32>
    %432 = vector.multi_reduction <maximumf>, %431, %cst_149 [0] : vector<8x128xf32> to vector<128xf32>
    %433 = vector.shape_cast %432 : vector<128xf32> to vector<1x128xf32>
    %434 = vector.broadcast %433 : vector<1x128xf32> to vector<8x128xf32>
    %435 = arith.subf %431, %434 : vector<8x128xf32>
    %436 = math.exp %435 : vector<8x128xf32>
    %cst_150 = arith.constant dense<0.000000e+00> : vector<128xf32>
    %437 = vector.multi_reduction <add>, %436, %cst_150 [0] : vector<8x128xf32> to vector<128xf32>
    %438 = vector.shape_cast %437 : vector<128xf32> to vector<1x128xf32>
    %439 = tpu.reciprocal %438 {approx = true} : vector<1x128xf32> -> vector<1x128xf32>
    %440 = vector.broadcast %439 : vector<1x128xf32> to vector<8x128xf32>
    %441 = arith.mulf %436, %440 : vector<8x128xf32>
    %c7_151 = arith.constant 7 : index
    %c0_152 = arith.constant 0 : index
    %c0_153 = arith.constant 0 : index
    %442 = vector.load %arg3[%c7_151, %c0_152, %c0_153] : memref<8x8x128xf32, #tpu.memory_space<vmem>>, vector<1x8x128xf32>
    %443 = vector.shape_cast %442 : vector<1x8x128xf32> to vector<8x128xf32>
    %444 = vector.shape_cast %441 : vector<8x128xf32> to vector<1x8x128xf32>
    tpu.vector_store %arg3[%c7_151, %c0_152, %c0_153], %444 {strides = array<i32>} : memref<8x8x128xf32, #tpu.memory_space<vmem>>, vector<1x8x128xf32>,
    %c7_154 = arith.constant 7 : index
    %c0_155 = arith.constant 0 : index
    %445 = vector.load %arg4[%c7_154, %c0_155] : memref<8x128xf32, #tpu.memory_space<vmem>>, vector<1x128xf32>
    tpu.vector_store %arg4[%c7_154, %c0_155], %439 {strides = array<i32>} : memref<8x128xf32, #tpu.memory_space<vmem>>, vector<1x128xf32>,
    %446 = vector.broadcast %433 : vector<1x128xf32> to vector<8x128xf32>
    %447 = arith.cmpf oge, %431, %446 : vector<8x128xf32>
    %c8_i32_156 = arith.constant 8 : i32
    %448 = vector.broadcast %c8_i32_156 : i32 to vector<8x128xi32>
    %449 = arith.select %447, %1, %448 : vector<8x128xi1>, vector<8x128xi32>
    %cst_157 = arith.constant dense<2147483647> : vector<128xi32>
    %450 = vector.multi_reduction <minsi>, %449, %cst_157 [0] : vector<8x128xi32> to vector<128xi32>
    %451 = vector.shape_cast %450 : vector<128xi32> to vector<1x128xi32>
    %c7_158 = arith.constant 7 : index
    %c0_159 = arith.constant 0 : index
    %452 = vector.load %arg5[%c7_158, %c0_159] : memref<8x128xi32, #tpu.memory_space<vmem>>, vector<1x128xi32>
    tpu.vector_store %arg5[%c7_158, %c0_159], %451 {strides = array<i32>} : memref<8x128xi32, #tpu.memory_space<vmem>>, vector<1x128xi32>,
    %453 = vector.broadcast %451 : vector<1x128xi32> to vector<8x128xi32>
    %454 = arith.cmpi eq, %1, %453 : vector<8x128xi32>
    %455 = arith.extui %454 : vector<8x128xi1> to vector<8x128xi32>
    %456 = arith.sitofp %455 : vector<8x128xi32> to vector<8x128xf32>
    %457 = vector.extract_strided_slice %0 {offsets = [0, 0, 0], sizes = [1, 8, 128], strides = [1, 1, 1]} : vector<2x8x128xf32> to vector<1x8x128xf32>
    %458 = vector.shape_cast %457 : vector<1x8x128xf32> to vector<8x128xf32>
    %459 = arith.mulf %456, %458 : vector<8x128xf32>
    %cst_160 = arith.constant dense<0.000000e+00> : vector<128xf32>
    %460 = vector.multi_reduction <add>, %459, %cst_160 [0] : vector<8x128xf32> to vector<128xf32>
    %461 = vector.shape_cast %460 : vector<128xf32> to vector<1x128xf32>
    %462 = vector.extract_strided_slice %0 {offsets = [1, 0, 0], sizes = [1, 8, 128], strides = [1, 1, 1]} : vector<2x8x128xf32> to vector<1x8x128xf32>
    %463 = vector.shape_cast %462 : vector<1x8x128xf32> to vector<8x128xf32>
    %464 = arith.mulf %456, %463 : vector<8x128xf32>
    %cst_161 = arith.constant dense<0.000000e+00> : vector<128xf32>
    %465 = vector.multi_reduction <add>, %464, %cst_161 [0] : vector<8x128xf32> to vector<128xf32>
    %466 = vector.shape_cast %465 : vector<128xf32> to vector<1x128xf32>
    %467 = arith.subf %461, %404 : vector<1x128xf32>
    %468 = arith.mulf %467, %467 : vector<1x128xf32>
    %469 = arith.subf %466, %409 : vector<1x128xf32>
    %470 = arith.mulf %469, %469 : vector<1x128xf32>
    %471 = arith.addf %468, %470 : vector<1x128xf32>
    %472 = math.sqrt %471 : vector<1x128xf32>
    %473 = arith.addf %416, %472 : vector<1x128xf32>
    %474 = arith.subf %51, %461 : vector<1x128xf32>
    %475 = arith.mulf %474, %474 : vector<1x128xf32>
    %476 = arith.subf %56, %466 : vector<1x128xf32>
    %477 = arith.mulf %476, %476 : vector<1x128xf32>
    %478 = arith.addf %475, %477 : vector<1x128xf32>
    %479 = math.sqrt %478 : vector<1x128xf32>
    %480 = arith.addf %473, %479 : vector<1x128xf32>
    %c0_162 = arith.constant 0 : index
    %c0_163 = arith.constant 0 : index
    %481 = vector.load %arg6[%c0_162, %c0_163] : memref<1x128xf32, #tpu.memory_space<vmem>>, vector<1x128xf32>
    tpu.vector_store %arg6[%c0_162, %c0_163], %480 {strides = array<i32>} : memref<1x128xf32, #tpu.memory_space<vmem>>, vector<1x128xf32>,
    return
  }
  func.func @transform_0(%arg0: i32) -> (i32, i32, i32) {
    %c0_i32 = arith.constant 0 : i32
    %c0_i32_0 = arith.constant 0 : i32
    %c0_i32_1 = arith.constant 0 : i32
    return %c0_i32, %c0_i32_0, %arg0 : i32, i32, i32
  }
  func.func @transform_1(%arg0: i32) -> (i32, i32) {
    %c0_i32 = arith.constant 0 : i32
    %c0_i32_0 = arith.constant 0 : i32
    %c0_i32_1 = arith.constant 0 : i32
    return %c0_i32, %c0_i32_0 : i32, i32
  }
  func.func @transform_2(%arg0: i32) -> (i32, i32, i32) {
    %c0_i32 = arith.constant 0 : i32
    %c0_i32_0 = arith.constant 0 : i32
    %c0_i32_1 = arith.constant 0 : i32
    return %c0_i32, %c0_i32_0, %arg0 : i32, i32, i32
  }
  func.func @transform_3(%arg0: i32) -> (i32, i32) {
    %c0_i32 = arith.constant 0 : i32
    %c0_i32_0 = arith.constant 0 : i32
    return %c0_i32, %arg0 : i32, i32
  }
  func.func @transform_4(%arg0: i32) -> (i32, i32) {
    %c0_i32 = arith.constant 0 : i32
    %c0_i32_0 = arith.constant 0 : i32
    return %c0_i32, %arg0 : i32, i32
  }
  func.func @transform_5(%arg0: i32) -> (i32, i32) {
    %c0_i32 = arith.constant 0 : i32
    %c0_i32_0 = arith.constant 0 : i32
    return %c0_i32, %arg0 : i32, i32
  }
  func.func @transform_6(%arg0: i32) -> (i32, i32, i32) {
    %c0_i32 = arith.constant 0 : i32
    %c0_i32_0 = arith.constant 0 : i32
    %c0_i32_1 = arith.constant 0 : i32
    return %c0_i32, %c0_i32_0, %arg0 : i32, i32, i32
  }
}

</mosaic_0001>

<bundles_post_ra>
// kernel: solver_forward.1
= control target key start
LH: loop header
LB: loop body
LE: loop exit
PB: predicated region body
PF: predicated region fallthrough
CT: control target
= control target key end

     0   :  { %12 = vsyncpa [#allocation3], 0  ;;  %s1071_s0 = inlined_call_operand.vmem [shape: f32[2,8,128], index: 0, kind: input, shape index: {}]   ;;  %s1072_s1 = inlined_call_operand.vmem [shape: f32[8,2], index: 1, kind: input, shape index: {}]   ;;  %s1073_s2 = inlined_call_operand.vmem [shape: f32[8,8,128], index: 2, kind: output, shape index: {0}]   ;;  %s1074_s3 = inlined_call_operand.vmem [shape: f32[8,128], index: 3, kind: output, shape index: {1}]   ;;  %s1075_s4 = inlined_call_operand.vmem [shape: s32[8,128], index: 4, kind: output, shape index: {2}]   ;;  %s1076_s5 = inlined_call_operand.vmem [shape: f32[1,128], index: 5, kind: output, shape index: {3}]   ;;  %s1077_s6 = inlined_call_operand.vmem [shape: f32[8,8,128], index: 6, kind: output, shape index: {4}]  }
   0x1   :  { %s21_s23 = sshll.u32 %s1072_s1, 4  ;;  %s22_s23 = int_to_ptr.vmem [resolvable:$true] %s21_s23 }
   0x2   :  { %s732_s24 = scalar_lea.vmem %s22_s23, 128  ;;  %p737_p1 = scmp.lt.s32.totalorder %s22_s23, %s22_s23 }
   0x3   :  { %p733_p0 = scmp.ne.s32.totalorder %s22_s23, %s732_s24  ;;  %p738_p2 = scmp.lt.s32.totalorder %s732_s24, %s732_s24 }
   0x5   :  { %p739_p3 = por %p738_p2, %p737_p1 }
   0x7   :  { %p740_p4 = pnand %p739_p3, %p733_p0 }
   0x9   :  { %743 = shalt.err (!%p740_p4)
}
   0xa   :  { %s746_s25 = smov [#allocation2]  }
   0xb   :  { %24 = dma.vmem_to_smem %s22_s23, 128, %s746_s25, [#allocation3]  }
   0xc   :  { %744 = dma.done.wait [#allocation3], 128  }
   0xd   :  { %745 = vsyncadd [#allocation3], 4294967168 }
   0xe   :  { %28 = sfence }
   0xf   :  { %s33_s26 = sld [smem:[#allocation2]]  ;;  %s643_s27 = sld [smem:[#allocation2 + $0x1]]  ;;  %v789_v0 = vld [vmem:[%s1071_s0] sm:$0xff]  ;;  %v794_v1 = vld [vmem:[%s1071_s0 + $0x8] sm:$0xff]  ;;  %v31_v30 = vlaneseq  ;;  %v747_v46 = vmov 0.0  }
  0x10   :  { %s645_s28 = sld [smem:[#allocation2 + $0x80]]  ;;  %s646_s29 = sld [smem:[#allocation2 + $0x81]] }
  0x11   :  { %s650_s30 = sld [smem:[#allocation2 + $0x100]]  ;;  %s651_s7 = sld [smem:[#allocation2 + $0x101]]  ;;  %v830_v33 = vshrl.u32 %v31_v30, 7 }
  0x12   :  { %s655_s1 = sld [smem:[#allocation2 + $0x180]]  ;;  %s656_s8 = sld [smem:[#allocation2 + $0x181]] }
  0x13   :  { %s660_s13 = sld [smem:[#allocation2 + $0x200]]  ;;  %s661_s14 = sld [smem:[#allocation2 + $0x201]] }
  0x14   :  { %s670_s12 = sld [smem:[#allocation2 + $0x300]]  ;;  %s676_s23 = sld [smem:[#allocation2 + $0x381]] }
  0x15   :  { %v34_v2 = vstv %s33_s26  ;;  %v37_v3 = vstv %s643_s27  ;;  %s665_s27 = sld [smem:[#allocation2 + $0x280]] }
  0x16   :  { %v35_v4 = vmul.f32 %v34_v2, %v789_v0  ;;  %v38_v5 = vmul.f32 %v37_v3, %v794_v1  ;;  %v93_v6 = vstv %s645_s28  ;;  %v96_v7 = vstv %s646_s29  ;;  %s666_s28 = sld [smem:[#allocation2 + $0x281]]  ;;  %s675_s22 = sld [smem:[#allocation2 + $0x380]] }
  0x17   :  { %v94_v8 = vmul.f32 %v93_v6, %v789_v0  ;;  %v97_v9 = vmul.f32 %v96_v7, %v794_v1  ;;  %v167_v10 = vstv %s650_s30  ;;  %v170_v11 = vstv %s651_s7 }
  0x18   :  { %v39_v12 = vadd.f32 %v38_v5, %v35_v4  ;;  %v168_v13 = vmul.f32 %v167_v10, %v789_v0  ;;  %v171_v14 = vmul.f32 %v170_v11, %v794_v1  ;;  %v241_v15 = vstv %s655_s1 }
  0x19   :  { %v98_v16 = vadd.f32 %v97_v9, %v94_v8  ;;  %v242_v17 = vmul.f32 %v241_v15, %v789_v0  ;;  %v244_v18 = vstv %s656_s8  ;;  %v315_v19 = vstv %s660_s13  ;;  %s671_s13 = sld [smem:[#allocation2 + $0x301]] }
  0x1a   :  { %40 = vst [vmem:[%s1077_s6] sm:$0xff] %v39_v12  ;;  %v42_v20 = vrot.slane %v39_v12, 4  ;;  %v806_v21 = vadd.f32 %v171_v14, %v168_v13  ;;  %v245_v22 = vmul.f32 %v244_v18, %v794_v1  ;;  %v316_v23 = vmul.f32 %v315_v19, %v789_v0 }
  0x1b   :  { %647 = vst [vmem:[%s1077_s6 + $0x8] sm:$0xff] %v98_v16  ;;  %v318_v24 = vstv %s661_s14  ;;  %v389_v54 = vstv %s665_s27 }
  0x1c   :  { %v43_v25 = vmax.f32 %v39_v12, %v42_v20  ;;  %652 = vst [vmem:[%s1077_s6 + $0x10] sm:$0xff] %v806_v21  ;;  %v817_v26 = vadd.f32 %v245_v22, %v242_v17  ;;  %v319_v27 = vmul.f32 %v318_v24, %v794_v1  ;;  %v392_v55 = vstv %s666_s28 }
  0x1d   :  { %v390_v57 = vmul.f32 %v389_v54, %v789_v0  ;;  %v393_v59 = vmul.f32 %v392_v55, %v794_v1 }
  0x1e   :  { %v44_v28 = vrot.slane %v43_v25, 2  ;;  %657 = vst [vmem:[%s1077_s6 + $0x18] sm:$0xff] %v817_v26  ;;  %v824_v29 = vadd.f32 %v319_v27, %v316_v23 }
  0x1f   :  { %v840_v62 = vadd.f32 %v393_v59, %v390_v57 }
  0x20   :  { %v45_v31 = vmax.f32 %v43_v25, %v44_v28  ;;  %662 = vst [vmem:[%s1077_s6 + $0x20] sm:$0xff] %v824_v29 }
  0x21   :  { %667 = vst [vmem:[%s1077_s6 + $0x28] sm:$0xff] %v840_v62 }
  0x22   :  { %v46_v32 = vrot.slane %v45_v31, 1 }
  0x24   :  { %v47_v34 = vmax.f32 %v45_v31, %v46_v32 }
  0x26   :  { %v48_v35 = vsub.f32 %v39_v12, %v47_v34  ;;  %vm61_vm0 = vcmp.ge.f32.partialorder %v39_v12, %v47_v34 }
  0x27   :  { %v62_v36 = vsel %vm61_vm0, %v830_v33, 8 }
  0x28   :  { %v49_v37 = vmul.f32 1.442695, %v48_v35  ;;  %v63_v38 = vrot.slane %v62_v36, 4 }
  0x2a   :  { %682 = vpow2.f32 %v49_v37  ;;  %vm64_vm1 = vcmp.lt.s32.totalorder %v62_v36, %v63_v38 }
  0x2b   :  { %v65_v39 = vsel %vm64_vm1, %v62_v36, %v63_v38 }
  0x2c   :  { %v66_v40 = vrot.slane %v65_v39, 2 }
  0x2e   :  { %vm67_vm2 = vcmp.lt.s32.totalorder %v65_v39, %v66_v40 }
  0x2f   :  { %v68_v41 = vsel %vm67_vm2, %v65_v39, %v66_v40 }
  0x30   :  { %v69_v42 = vrot.slane %v68_v41, 1 }
  0x32   :  { %vm70_vm3 = vcmp.lt.s32.totalorder %v68_v41, %v69_v42 }
  0x33   :  { %v71_v43 = vsel %vm70_vm3, %v68_v41, %v69_v42 }
  0x34   :  { %v683_v44 = vpop.eup %682  ;;  %72 = vst [vmem:[%s1075_s4] sm:$0x1] %v71_v43  ;;  %vm73_vm4 = vcmp.eq.s32.totalorder %v830_v33, %v71_v43 }
  0x35   :  { %v51_v45 = vrot.slane %v683_v44, 4  ;;  %v644_v47 = vsel %vm73_vm4, 1.0, %v747_v46 }
  0x36   :  { %v76_v48 = vmul.f32 -1e+09, %v644_v47  ;;  %v78_v5 = vmul.f32 %v644_v47, %v789_v0  ;;  %v85_v7 = vmul.f32 %v644_v47, %v794_v1 }
  0x37   :  { %v52_v49 = vadd.f32 %v683_v44, %v51_v45 }
  0x38   :  { %v101_v50 = vadd.f32 %v98_v16, %v76_v48  ;;  %v79_v11 = vrot.slane %v78_v5, 4  ;;  %v86_v14 = vrot.slane %v85_v7, 4 }
  0x39   :  { %v53_v51 = vrot.slane %v52_v49, 2 }
  0x3a   :  { %v102_v52 = vrot.slane %v101_v50, 4  ;;  %v80_v16 = vadd.f32 %v79_v11, %v78_v5  ;;  %v87_v18 = vadd.f32 %v86_v14, %v85_v7 }
  0x3b   :  { %v54_v53 = vadd.f32 %v53_v51, %v52_v49 }
  0x3c   :  { %v103_v56 = vmax.f32 %v101_v50, %v102_v52  ;;  %v81_v20 = vrot.slane %v80_v16, 2  ;;  %v88_v24 = vrot.slane %v87_v18, 2  ;;  %v463_v52 = vstv %s670_s12 }
  0x3d   :  { %v55_v58 = vrot.slane %v54_v53, 1 }
  0x3e   :  { %v104_v60 = vrot.slane %v103_v56, 2  ;;  %v82_v32 = vadd.f32 %v81_v20, %v80_v16  ;;  %v89_v35 = vadd.f32 %v88_v24, %v87_v18 }
  0x3f   :  { %v56_v61 = vadd.f32 %v55_v58, %v54_v53  ;;  %v466_v53 = vstv %s671_s13 }
  0x40   :  { %v105_v63 = vmax.f32 %v103_v56, %v104_v60  ;;  %v83_v43 = vrot.slane %v82_v32, 1  ;;  %v90_v45 = vrot.slane %v89_v35, 1  ;;  %v467_v59 = vmul.f32 %v466_v53, %v794_v1 }
  0x41   :  { %684 = vrcp.f32 %v56_v61 }
  0x42   :  { %v106_v2 = vrot.slane %v105_v63, 1  ;;  %v867_v57 = vadd.f32 %v83_v43, %v82_v32 }
  0x44   :  { %v107_v3 = vmax.f32 %v105_v63, %v106_v2 }
  0x46   :  { %v108_v4 = vsub.f32 %v101_v50, %v107_v3  ;;  %vm122_vm5 = vcmp.ge.f32.partialorder %v101_v50, %v107_v3 }
  0x47   :  { %v123_v6 = vsel %vm122_vm5, %v830_v33, 8 }
  0x48   :  { %v109_v8 = vmul.f32 1.442695, %v108_v4  ;;  %v124_v9 = vrot.slane %v123_v6, 4 }
  0x4a   :  { %686 = vpow2.f32 %v109_v8  ;;  %vm125_vm6 = vcmp.lt.s32.totalorder %v123_v6, %v124_v9 }
  0x4b   :  { %v685_v10 = vpop.eup %684  ;;  %v126_v12 = vsel %vm125_vm6, %v123_v6, %v124_v9 }
  0x4c   :  { %v58_v13 = vmul.f32 %v685_v10, %v683_v44  ;;  %60 = vst [vmem:[%s1074_s3] sm:$0x1] %v685_v10  ;;  %v127_v15 = vrot.slane %v126_v12, 2 }
  0x4e   :  { %59 = vst [vmem:[%s1073_s2] sm:$0xff] %v58_v13  ;;  %vm128_vm7 = vcmp.lt.s32.totalorder %v126_v12, %v127_v15 }
  0x4f   :  { %v129_v17 = vsel %vm128_vm7, %v126_v12, %v127_v15 }
  0x50   :  { %v130_v19 = vrot.slane %v129_v17, 1 }
  0x52   :  { %vm131_vm8 = vcmp.lt.s32.totalorder %v129_v17, %v130_v19 }
  0x53   :  { %v132_v22 = vsel %vm131_vm8, %v129_v17, %v130_v19 }
  0x54   :  { %v687_v23 = vpop.eup %686  ;;  %133 = vst [vmem:[%s1075_s4 + $0x1] sm:$0x1] %v132_v22  ;;  %vm134_vm9 = vcmp.eq.s32.totalorder %v830_v33, %v132_v22 }
  0x55   :  { %v111_v25 = vrot.slane %v687_v23, 4  ;;  %v649_v27 = vsel %vm134_vm9, 1.0, %v747_v46 }
  0x56   :  { %v137_v28 = vmul.f32 -1e+09, %v649_v27  ;;  %v139_v30 = vmul.f32 %v649_v27, %v789_v0  ;;  %v146_v31 = vmul.f32 %v649_v27, %v794_v1 }
  0x57   :  { %v112_v34 = vadd.f32 %v687_v23, %v111_v25 }
  0x58   :  { %v140_v36 = vrot.slane %v139_v30, 4  ;;  %v147_v37 = vrot.slane %v146_v31, 4  ;;  %v862_v38 = vadd.f32 %v137_v28, %v76_v48  ;;  %v464_v48 = vmul.f32 %v463_v52, %v789_v0 }
  0x59   :  { %v113_v39 = vrot.slane %v112_v34, 2 }
  0x5a   :  { %v141_v40 = vadd.f32 %v140_v36, %v139_v30  ;;  %v148_v41 = vadd.f32 %v147_v37, %v146_v31  ;;  %v175_v42 = vadd.f32 %v806_v21, %v862_v38  ;;  %v870_v21 = vadd.f32 %v90_v45, %v89_v35 }
  0x5b   :  { %v114_v44 = vadd.f32 %v113_v39, %v112_v34  ;;  %v872_v2 = vadd.f32 %v467_v59, %v464_v48 }
  0x5c   :  { %v142_v47 = vrot.slane %v141_v40, 2  ;;  %v149_v49 = vrot.slane %v148_v41, 2  ;;  %v176_v50 = vrot.slane %v175_v42, 4 }
  0x5d   :  { %v115_v51 = vrot.slane %v114_v44, 1  ;;  %672 = vst [vmem:[%s1077_s6 + $0x30] sm:$0xff] %v872_v2 }
  0x5e   :  { %v143_v54 = vadd.f32 %v142_v47, %v141_v40  ;;  %v150_v55 = vadd.f32 %v149_v49, %v148_v41  ;;  %v177_v56 = vmax.f32 %v175_v42, %v176_v50  ;;  %v537_v50 = vstv %s675_s22 }
  0x5f   :  { %v116_v58 = vadd.f32 %v115_v51, %v114_v44  ;;  %v540_v51 = vstv %s676_s23 }
  0x60   :  { %v144_v60 = vrot.slane %v143_v54, 1  ;;  %v151_v61 = vrot.slane %v150_v55, 1  ;;  %v178_v63 = vrot.slane %v177_v56, 2 }
  0x61   :  { %688 = vrcp.f32 %v116_v58 }
  0x62   :  { %v874_v3 = vadd.f32 %v144_v60, %v143_v54  ;;  %v876_v4 = vadd.f32 %v151_v61, %v150_v55  ;;  %v179_v5 = vmax.f32 %v177_v56, %v178_v63  ;;  %v538_v55 = vmul.f32 %v537_v50, %v789_v0 }
  0x63   :  { %v541_v56 = vmul.f32 %v540_v51, %v794_v1 }
  0x64   :  { %v153_v6 = vsub.f32 %v874_v3, %v867_v57  ;;  %v155_v7 = vsub.f32 %v876_v4, %v870_v21  ;;  %v180_v8 = vrot.slane %v179_v5, 1 }
  0x66   :  { %v154_v9 = vmul.f32 %v153_v6, %v153_v6  ;;  %v156_v10 = vmul.f32 %v155_v7, %v155_v7  ;;  %v181_v11 = vmax.f32 %v179_v5, %v180_v8 }
  0x68   :  { %v886_v12 = vadd.f32 %v156_v10, %v154_v9  ;;  %v182_v13 = vsub.f32 %v175_v42, %v181_v11  ;;  %vm196_vm10 = vcmp.ge.f32.partialorder %v175_v42, %v181_v11 }
  0x69   :  { %v197_v14 = vsel %vm196_vm10, %v830_v33, 8 }
  0x6a   :  { %v183_v15 = vmul.f32 1.442695, %v182_v13  ;;  %v198_v16 = vrot.slane %v197_v14, 4  ;;  %vm160_vm8 = vcmp.eq.f32.partialorder %v886_v12, inf  ;;  %vm162_vm9 = vcmp.eq.f32.partialorder %v886_v12, 0.0 }
  0x6b   :  { %v689_v17 = vpop.eup %688 }
  0x6c   :  { %v118_v18 = vmul.f32 %v689_v17, %v687_v23  ;;  %121 = vst [vmem:[%s1074_s3 + $0x1] sm:$0x1] %v689_v17  ;;  %690 = vpow2.f32 %v183_v15  ;;  %vm199_vm11 = vcmp.lt.s32.totalorder %v197_v14, %v198_v16 }
  0x6d   :  { %v200_v19 = vsel %vm199_vm11, %v197_v14, %v198_v16 }
  0x6e   :  { %648 = vst [vmem:[%s1073_s2 + $0x8] sm:$0xff] %v118_v18  ;;  %v201_v20 = vrot.slane %v200_v19, 2 }
  0x70   :  { %vm202_vm12 = vcmp.lt.s32.totalorder %v200_v19, %v201_v20 }
  0x71   :  { %v203_v22 = vsel %vm202_vm12, %v200_v19, %v201_v20 }
  0x72   :  { %v204_v24 = vrot.slane %v203_v22, 1 }
  0x74   :  { %vm205_vm13 = vcmp.lt.s32.totalorder %v203_v22, %v204_v24 }
  0x75   :  { %v206_v25 = vsel %vm205_vm13, %v203_v22, %v204_v24 }
  0x76   :  { %v691_v27 = vpop.eup %690  ;;  %207 = vst [vmem:[%s1075_s4 + $0x2] sm:$0x1] %v206_v25  ;;  %vm208_vm14 = vcmp.eq.s32.totalorder %v830_v33, %v206_v25 }
  0x77   :  { %v185_v23 = vrot.slane %v691_v27, 4  ;;  %v654_v28 = vsel %vm208_vm14, 1.0, %v747_v46 }
  0x78   :  { %v211_v30 = vmul.f32 -1e+09, %v654_v28  ;;  %v213_v31 = vmul.f32 %v654_v28, %v789_v0  ;;  %v220_v32 = vmul.f32 %v654_v28, %v794_v1 }
  0x79   :  { %v186_v34 = vadd.f32 %v691_v27, %v185_v23 }
  0x7a   :  { %v214_v35 = vrot.slane %v213_v31, 4  ;;  %v221_v36 = vrot.slane %v220_v32, 4  ;;  %v903_v37 = vadd.f32 %v211_v30, %v862_v38 }
  0x7b   :  { %v187_v39 = vrot.slane %v186_v34, 2 }
  0x7c   :  { %v215_v40 = vadd.f32 %v214_v35, %v213_v31  ;;  %v222_v41 = vadd.f32 %v221_v36, %v220_v32  ;;  %v249_v42 = vadd.f32 %v817_v26, %v903_v37  ;;  %v909_v26 = vadd.f32 %v541_v56, %v538_v55 }
  0x7d   :  { %v188_v43 = vadd.f32 %v187_v39, %v186_v34 }
  0x7e   :  { %v216_v44 = vrot.slane %v215_v40, 2  ;;  %v223_v45 = vrot.slane %v222_v41, 2  ;;  %v250_v47 = vrot.slane %v249_v42, 4  ;;  %677 = vst [vmem:[%s1077_s6 + $0x38] sm:$0xff] %v909_v26 }
  0x7f   :  { %v189_v49 = vrot.slane %v188_v43, 1 }
  0x80   :  { %v217_v52 = vadd.f32 %v216_v44, %v215_v40  ;;  %v224_v53 = vadd.f32 %v223_v45, %v222_v41  ;;  %v251_v54 = vmax.f32 %v249_v42, %v250_v47 }
  0x81   :  { %v190_v38 = vadd.f32 %v189_v49, %v188_v43 }
  0x82   :  { %v218_v48 = vrot.slane %v217_v52, 1  ;;  %v225_v58 = vrot.slane %v224_v53, 1  ;;  %v252_v59 = vrot.slane %v251_v54, 2 }
  0x83   :  { %692 = vrcp.f32 %v190_v38 }
  0x84   :  { %v219_v60 = vadd.f32 %v218_v48, %v217_v52  ;;  %v226_v61 = vadd.f32 %v225_v58, %v224_v53  ;;  %v253_v63 = vmax.f32 %v251_v54, %v252_v59 }
  0x86   :  { %v227_v5 = vsub.f32 %v219_v60, %v874_v3  ;;  %v229_v6 = vsub.f32 %v226_v61, %v876_v4  ;;  %v254_v7 = vrot.slane %v253_v63, 1 }
  0x88   :  { %v228_v8 = vmul.f32 %v227_v5, %v227_v5  ;;  %v230_v9 = vmul.f32 %v229_v6, %v229_v6  ;;  %v255_v10 = vmax.f32 %v253_v63, %v254_v7 }
  0x8a   :  { %v917_v11 = vadd.f32 %v230_v9, %v228_v8  ;;  %v256_v13 = vsub.f32 %v249_v42, %v255_v10  ;;  %vm270_vm15 = vcmp.ge.f32.partialorder %v249_v42, %v255_v10 }
  0x8b   :  { %v271_v14 = vsel %vm270_vm15, %v830_v33, 8 }
  0x8c   :  { %v257_v15 = vmul.f32 1.442695, %v256_v13  ;;  %v272_v16 = vrot.slane %v271_v14, 4  ;;  %vm234_vm10 = vcmp.eq.f32.partialorder %v917_v11, inf  ;;  %vm236_vm12 = vcmp.eq.f32.partialorder %v917_v11, 0.0 }
  0x8d   :  { %v693_v17 = vpop.eup %692 }
  0x8e   :  { %v192_v18 = vmul.f32 %v693_v17, %v691_v27  ;;  %195 = vst [vmem:[%s1074_s3 + $0x2] sm:$0x1] %v693_v17  ;;  %694 = vpow2.f32 %v257_v15  ;;  %vm273_vm0 = vcmp.lt.s32.totalorder %v271_v14, %v272_v16 }
  0x8f   :  { %v274_v3 = vsel %vm273_vm0, %v271_v14, %v272_v16 }
  0x90   :  { %653 = vst [vmem:[%s1073_s2 + $0x10] sm:$0xff] %v192_v18  ;;  %v275_v4 = vrot.slane %v274_v3, 2 }
  0x92   :  { %vm276_vm1 = vcmp.lt.s32.totalorder %v274_v3, %v275_v4 }
  0x93   :  { %v277_v19 = vsel %vm276_vm1, %v274_v3, %v275_v4 }
  0x94   :  { %v278_v20 = vrot.slane %v277_v19, 1 }
  0x96   :  { %vm279_vm2 = vcmp.lt.s32.totalorder %v277_v19, %v278_v20 }
  0x97   :  { %v280_v22 = vsel %vm279_vm2, %v277_v19, %v278_v20  ;;  %v163_v19 = vand.u32 2147483648, %v886_v12 }
  0x98   :  { %v695_v24 = vpop.eup %694  ;;  %281 = vst [vmem:[%s1075_s4 + $0x3] sm:$0x1] %v280_v22  ;;  %vm282_vm3 = vcmp.eq.s32.totalorder %v830_v33, %v280_v22 }
  0x99   :  { %v259_v25 = vrot.slane %v695_v24, 4  ;;  %v659_v27 = vsel %vm282_vm3, 1.0, %v747_v46 }
  0x9a   :  { %v285_v23 = vmul.f32 -1e+09, %v659_v27  ;;  %v287_v28 = vmul.f32 %v659_v27, %v789_v0  ;;  %v294_v30 = vmul.f32 %v659_v27, %v794_v1 }
  0x9b   :  { %v260_v31 = vadd.f32 %v695_v24, %v259_v25 }
  0x9c   :  { %v288_v32 = vrot.slane %v287_v28, 4  ;;  %v295_v34 = vrot.slane %v294_v30, 4  ;;  %v934_v35 = vadd.f32 %v285_v23, %v903_v37 }
  0x9d   :  { %v261_v36 = vrot.slane %v260_v31, 2 }
  0x9e   :  { %v289_v39 = vadd.f32 %v288_v32, %v287_v28  ;;  %v296_v40 = vadd.f32 %v295_v34, %v294_v30  ;;  %v323_v41 = vadd.f32 %v824_v29, %v934_v35 }
  0x9f   :  { %v262_v42 = vadd.f32 %v261_v36, %v260_v31  ;;  %v237_v31 = vand.u32 2147483648, %v917_v11 }
  0xa0   :  { %v290_v43 = vrot.slane %v289_v39, 2  ;;  %v297_v44 = vrot.slane %v296_v40, 2  ;;  %v324_v45 = vrot.slane %v323_v41, 4 }
  0xa1   :  { %v263_v47 = vrot.slane %v262_v42, 1 }
  0xa2   :  { %v291_v49 = vadd.f32 %v290_v43, %v289_v39  ;;  %v298_v50 = vadd.f32 %v297_v44, %v296_v40  ;;  %v325_v51 = vmax.f32 %v323_v41, %v324_v45 }
  0xa3   :  { %v264_v52 = vadd.f32 %v263_v47, %v262_v42 }
  0xa4   :  { %v292_v53 = vrot.slane %v291_v49, 1  ;;  %v299_v54 = vrot.slane %v298_v50, 1  ;;  %v326_v55 = vrot.slane %v325_v51, 2 }
  0xa5   :  { %696 = vrcp.f32 %v264_v52 }
  0xa6   :  { %v938_v37 = vadd.f32 %v292_v53, %v291_v49  ;;  %v940_v38 = vadd.f32 %v299_v54, %v298_v50  ;;  %v327_v56 = vmax.f32 %v325_v51, %v326_v55  ;;  %698 = vrsqrt.f32 %v886_v12 }
  0xa7   :  { %700 = vrsqrt.f32 %v917_v11 }
  0xa8   :  { %v301_v29 = vsub.f32 %v938_v37, %v219_v60  ;;  %v303_v48 = vsub.f32 %v940_v38, %v226_v61  ;;  %v328_v58 = vrot.slane %v327_v56, 1 }
  0xaa   :  { %v302_v59 = vmul.f32 %v301_v29, %v301_v29  ;;  %v304_v63 = vmul.f32 %v303_v48, %v303_v48  ;;  %v329_v5 = vmax.f32 %v327_v56, %v328_v58 }
  0xac   :  { %v305_v6 = vadd.f32 %v304_v63, %v302_v59  ;;  %v330_v7 = vsub.f32 %v323_v41, %v329_v5  ;;  %vm344_vm4 = vcmp.ge.f32.partialorder %v323_v41, %v329_v5 }
  0xad   :  { %v345_v8 = vsel %vm344_vm4, %v830_v33, 8 }
  0xae   :  { %v331_v9 = vmul.f32 1.442695, %v330_v7  ;;  %v346_v10 = vrot.slane %v345_v8, 4  ;;  %702 = vrsqrt.f32 %v305_v6  ;;  %vm308_vm13 = vcmp.eq.f32.partialorder %v305_v6, inf }
  0xaf   :  { %v697_v13 = vpop.eup %696  ;;  %vm310_vm14 = vcmp.eq.f32.partialorder %v305_v6, 0.0  ;;  %v311_v49 = vand.u32 2147483648, %v305_v6 }
  0xb0   :  { %v266_v60 = vmul.f32 %v697_v13, %v695_v24  ;;  %269 = vst [vmem:[%s1074_s3 + $0x3] sm:$0x1] %v697_v13  ;;  %704 = vpow2.f32 %v331_v9  ;;  %vm347_vm5 = vcmp.lt.s32.totalorder %v345_v8, %v346_v10  ;;  %v699_v16 = vpop.eup %698 }
  0xb1   :  { %v348_v61 = vsel %vm347_vm5, %v345_v8, %v346_v10  ;;  %v701_v18 = vpop.eup %700  ;;  %v159_v3 = vmul.f32 %v699_v16, %v886_v12 }
  0xb2   :  { %658 = vst [vmem:[%s1073_s2 + $0x18] sm:$0xff] %v266_v60  ;;  %v349_v14 = vrot.slane %v348_v61, 2  ;;  %v233_v20 = vmul.f32 %v701_v18, %v917_v11 }
  0xb3   :  { %v161_v24 = vsel %vm160_vm8, %v886_v12, %v159_v3 }
  0xb4   :  { %vm350_vm6 = vcmp.lt.s32.totalorder %v348_v61, %v349_v14  ;;  %v164_v27 = vsel %vm162_vm9, %v163_v19, %v161_v24  ;;  %v235_v23 = vsel %vm234_vm10, %v917_v11, %v233_v20 }
  0xb5   :  { %v351_v15 = vsel %vm350_vm6, %v348_v61, %v349_v14  ;;  %v238_v40 = vsel %vm236_vm12, %v237_v31, %v235_v23 }
  0xb6   :  { %v352_v17 = vrot.slane %v351_v15, 1  ;;  %v239_v45 = vadd.f32 %v238_v40, %v164_v27 }
  0xb8   :  { %v703_v4 = vpop.eup %702  ;;  %vm353_vm7 = vcmp.lt.s32.totalorder %v351_v15, %v352_v17 }
  0xb9   :  { %v354_v22 = vsel %vm353_vm7, %v351_v15, %v352_v17  ;;  %v307_v12 = vmul.f32 %v703_v4, %v305_v6 }
  0xba   :  { %v705_v25 = vpop.eup %704  ;;  %355 = vst [vmem:[%s1075_s4 + $0x4] sm:$0x1] %v354_v22  ;;  %vm356_vm11 = vcmp.eq.s32.totalorder %v830_v33, %v354_v22 }
  0xbb   :  { %v333_v28 = vrot.slane %v705_v25, 4  ;;  %v664_v30 = vsel %vm356_vm11, 1.0, %v747_v46  ;;  %v309_v41 = vsel %vm308_vm13, %v305_v6, %v307_v12 }
  0xbc   :  { %v359_v32 = vmul.f32 -1e+09, %v664_v30  ;;  %v361_v34 = vmul.f32 %v664_v30, %v789_v0  ;;  %v368_v36 = vmul.f32 %v664_v30, %v794_v1  ;;  %v312_v53 = vsel %vm310_vm14, %v311_v49, %v309_v41 }
  0xbd   :  { %v334_v39 = vadd.f32 %v705_v25, %v333_v28  ;;  %v313_v29 = vadd.f32 %v312_v53, %v239_v45 }
  0xbe   :  { %v362_v42 = vrot.slane %v361_v34, 4  ;;  %v369_v43 = vrot.slane %v368_v36, 4  ;;  %v971_v44 = vadd.f32 %v359_v32, %v934_v35 }
  0xbf   :  { %v335_v47 = vrot.slane %v334_v39, 2 }
  0xc0   :  { %v363_v11 = vadd.f32 %v362_v42, %v361_v34  ;;  %v370_v50 = vadd.f32 %v369_v43, %v368_v36  ;;  %v397_v51 = vadd.f32 %v840_v62, %v971_v44 }
  0xc1   :  { %v336_v52 = vadd.f32 %v335_v47, %v334_v39 }
  0xc2   :  { %v364_v54 = vrot.slane %v363_v11, 2  ;;  %v371_v55 = vrot.slane %v370_v50, 2  ;;  %v398_v56 = vrot.slane %v397_v51, 4 }
  0xc3   :  { %v337_v48 = vrot.slane %v336_v52, 1 }
  0xc4   :  { %v365_v58 = vadd.f32 %v364_v54, %v363_v11  ;;  %v372_v59 = vadd.f32 %v371_v55, %v370_v50  ;;  %v399_v63 = vmax.f32 %v397_v51, %v398_v56 }
  0xc5   :  { %v338_v35 = vadd.f32 %v337_v48, %v336_v52 }
  0xc6   :  { %v366_v5 = vrot.slane %v365_v58, 1  ;;  %v373_v7 = vrot.slane %v372_v59, 1  ;;  %v400_v8 = vrot.slane %v399_v63, 2 }
  0xc7   :  { %706 = vrcp.f32 %v338_v35 }
  0xc8   :  { %v975_v6 = vadd.f32 %v366_v5, %v365_v58  ;;  %v977_v9 = vadd.f32 %v373_v7, %v372_v59  ;;  %v401_v62 = vmax.f32 %v399_v63, %v400_v8 }
  0xca   :  { %v375_v10 = vsub.f32 %v975_v6, %v938_v37  ;;  %v377_v13 = vsub.f32 %v977_v9, %v940_v38  ;;  %v402_v60 = vrot.slane %v401_v62, 1 }
  0xcc   :  { %v376_v61 = vmul.f32 %v375_v10, %v375_v10  ;;  %v378_v14 = vmul.f32 %v377_v13, %v377_v13  ;;  %v403_v15 = vmax.f32 %v401_v62, %v402_v60 }
  0xce   :  { %v379_v16 = vadd.f32 %v378_v14, %v376_v61  ;;  %v404_v17 = vsub.f32 %v397_v51, %v403_v15  ;;  %vm418_vm15 = vcmp.ge.f32.partialorder %v397_v51, %v403_v15 }
  0xcf   :  { %v419_v18 = vsel %vm418_vm15, %v830_v33, 8 }
  0xd0   :  { %v405_v3 = vmul.f32 1.442695, %v404_v17  ;;  %v420_v4 = vrot.slane %v419_v18, 4  ;;  %708 = vrsqrt.f32 %v379_v16  ;;  %vm382_vm3 = vcmp.eq.f32.partialorder %v379_v16, inf }
  0xd1   :  { %v707_v19 = vpop.eup %706  ;;  %v385_v23 = vand.u32 2147483648, %v379_v16  ;;  %vm384_vm4 = vcmp.eq.f32.partialorder %v379_v16, 0.0 }
  0xd2   :  { %v340_v20 = vmul.f32 %v707_v19, %v705_v25  ;;  %343 = vst [vmem:[%s1074_s3 + $0x4] sm:$0x1] %v707_v19  ;;  %710 = vpow2.f32 %v405_v3  ;;  %vm421_vm0 = vcmp.lt.s32.totalorder %v419_v18, %v420_v4 }
  0xd3   :  { %v422_v37 = vsel %vm421_vm0, %v419_v18, %v420_v4 }
  0xd4   :  { %663 = vst [vmem:[%s1073_s2 + $0x20] sm:$0xff] %v340_v20  ;;  %v423_v38 = vrot.slane %v422_v37, 2 }
  0xd6   :  { %vm424_vm1 = vcmp.lt.s32.totalorder %v422_v37, %v423_v38 }
  0xd7   :  { %v425_v22 = vsel %vm424_vm1, %v422_v37, %v423_v38 }
  0xd8   :  { %v426_v24 = vrot.slane %v425_v22, 1 }
  0xda   :  { %v709_v27 = vpop.eup %708  ;;  %vm427_vm2 = vcmp.lt.s32.totalorder %v425_v22, %v426_v24 }
  0xdb   :  { %v428_v25 = vsel %vm427_vm2, %v425_v22, %v426_v24  ;;  %v381_v28 = vmul.f32 %v709_v27, %v379_v16 }
  0xdc   :  { %v711_v30 = vpop.eup %710  ;;  %429 = vst [vmem:[%s1075_s4 + $0x5] sm:$0x1] %v428_v25  ;;  %vm430_vm5 = vcmp.eq.s32.totalorder %v830_v33, %v428_v25 }
  0xdd   :  { %v407_v31 = vrot.slane %v711_v30, 4  ;;  %v669_v12 = vsel %vm430_vm5, 1.0, %v747_v46  ;;  %v383_v32 = vsel %vm382_vm3, %v379_v16, %v381_v28 }
  0xde   :  { %v433_v34 = vmul.f32 -1e+09, %v669_v12  ;;  %v435_v36 = vmul.f32 %v669_v12, %v789_v0  ;;  %v442_v39 = vmul.f32 %v669_v12, %v794_v1  ;;  %v386_v40 = vsel %vm384_vm4, %v385_v23, %v383_v32 }
  0xdf   :  { %v408_v41 = vadd.f32 %v711_v30, %v407_v31  ;;  %v997_v42 = vadd.f32 %v386_v40, %v313_v29 }
  0xe0   :  { %v436_v43 = vrot.slane %v435_v36, 4  ;;  %v443_v45 = vrot.slane %v442_v39, 4  ;;  %v1000_v47 = vadd.f32 %v433_v34, %v971_v44 }
  0xe1   :  { %v409_v49 = vrot.slane %v408_v41, 2 }
  0xe2   :  { %v437_v11 = vadd.f32 %v436_v43, %v435_v36  ;;  %v444_v50 = vadd.f32 %v443_v45, %v442_v39  ;;  %v471_v51 = vadd.f32 %v872_v2, %v1000_v47 }
  0xe3   :  { %v410_v52 = vadd.f32 %v409_v49, %v408_v41 }
  0xe4   :  { %v438_v53 = vrot.slane %v437_v11, 2  ;;  %v445_v54 = vrot.slane %v444_v50, 2  ;;  %v472_v55 = vrot.slane %v471_v51, 4 }
  0xe5   :  { %v411_v56 = vrot.slane %v410_v52, 1 }
  0xe6   :  { %v439_v48 = vadd.f32 %v438_v53, %v437_v11  ;;  %v446_v58 = vadd.f32 %v445_v54, %v444_v50  ;;  %v473_v29 = vmax.f32 %v471_v51, %v472_v55 }
  0xe7   :  { %v412_v59 = vadd.f32 %v411_v56, %v410_v52 }
  0xe8   :  { %v440_v63 = vrot.slane %v439_v48, 1  ;;  %v447_v35 = vrot.slane %v446_v58, 1  ;;  %v474_v5 = vrot.slane %v473_v29, 2 }
  0xe9   :  { %712 = vrcp.f32 %v412_v59 }
  0xea   :  { %v1004_v44 = vadd.f32 %v440_v63, %v439_v48  ;;  %v1006_v7 = vadd.f32 %v447_v35, %v446_v58  ;;  %v475_v8 = vmax.f32 %v473_v29, %v474_v5 }
  0xec   :  { %v449_v2 = vsub.f32 %v1004_v44, %v975_v6  ;;  %v451_v62 = vsub.f32 %v1006_v7, %v977_v9  ;;  %v476_v10 = vrot.slane %v475_v8, 1 }
  0xee   :  { %v450_v13 = vmul.f32 %v449_v2, %v449_v2  ;;  %v452_v60 = vmul.f32 %v451_v62, %v451_v62  ;;  %v477_v61 = vmax.f32 %v475_v8, %v476_v10 }
  0xf0   :  { %v453_v14 = vadd.f32 %v452_v60, %v450_v13  ;;  %v478_v15 = vsub.f32 %v471_v51, %v477_v61  ;;  %vm492_vm6 = vcmp.ge.f32.partialorder %v471_v51, %v477_v61 }
  0xf1   :  { %v493_v16 = vsel %vm492_vm6, %v830_v33, 8 }
  0xf2   :  { %v479_v17 = vmul.f32 1.442695, %v478_v15  ;;  %v494_v18 = vrot.slane %v493_v16, 4  ;;  %714 = vrsqrt.f32 %v453_v14  ;;  %vm456_vm10 = vcmp.eq.f32.partialorder %v453_v14, inf }
  0xf3   :  { %v713_v3 = vpop.eup %712  ;;  %v459_v38 = vand.u32 2147483648, %v453_v14  ;;  %vm458_vm11 = vcmp.eq.f32.partialorder %v453_v14, 0.0 }
  0xf4   :  { %v414_v4 = vmul.f32 %v713_v3, %v711_v30  ;;  %417 = vst [vmem:[%s1074_s3 + $0x5] sm:$0x1] %v713_v3  ;;  %716 = vpow2.f32 %v479_v17  ;;  %vm495_vm7 = vcmp.lt.s32.totalorder %v493_v16, %v494_v18 }
  0xf5   :  { %v496_v6 = vsel %vm495_vm7, %v493_v16, %v494_v18 }
  0xf6   :  { %668 = vst [vmem:[%s1073_s2 + $0x28] sm:$0xff] %v414_v4  ;;  %v497_v9 = vrot.slane %v496_v6, 2 }
  0xf8   :  { %vm498_vm8 = vcmp.lt.s32.totalorder %v496_v6, %v497_v9 }
  0xf9   :  { %v499_v19 = vsel %vm498_vm8, %v496_v6, %v497_v9 }
  0xfa   :  { %v500_v20 = vrot.slane %v499_v19, 1 }
  0xfc   :  { %v715_v37 = vpop.eup %714  ;;  %vm501_vm9 = vcmp.lt.s32.totalorder %v499_v19, %v500_v20 }
  0xfd   :  { %v502_v22 = vsel %vm501_vm9, %v499_v19, %v500_v20  ;;  %v455_v24 = vmul.f32 %v715_v37, %v453_v14 }
  0xfe   :  { %v717_v27 = vpop.eup %716  ;;  %503 = vst [vmem:[%s1075_s4 + $0x6] sm:$0x1] %v502_v22  ;;  %vm504_vm12 = vcmp.eq.s32.totalorder %v830_v33, %v502_v22 }
  0xff   :  { %v481_v23 = vrot.slane %v717_v27, 4  ;;  %v674_v25 = vsel %vm504_vm12, 1.0, %v747_v46  ;;  %v457_v28 = vsel %vm456_vm10, %v453_v14, %v455_v24  ;;  %v731_v24 = vld [vmem:[%s1071_s0 + $0x8] sm:$0xff] }
 0x100   :  { %v507_v30 = vmul.f32 -1e+09, %v674_v25  ;;  %v509_v31 = vmul.f32 %v674_v25, %v789_v0  ;;  %v516_v12 = vmul.f32 %v674_v25, %v794_v1  ;;  %v460_v32 = vsel %vm458_vm11, %v459_v38, %v457_v28  ;;  %v730_v38 = vld [vmem:[%s1071_s0] sm:$0xff] }
 0x101   :  { %v482_v34 = vadd.f32 %v717_v27, %v481_v23  ;;  %v1027_v36 = vadd.f32 %v460_v32, %v997_v42 }
 0x102   :  { %v510_v39 = vrot.slane %v509_v31, 4  ;;  %v517_v40 = vrot.slane %v516_v12, 4  ;;  %v508_v41 = vadd.f32 %v507_v30, %v1000_v47 }
 0x103   :  { %v483_v43 = vrot.slane %v482_v34, 2 }
 0x104   :  { %v511_v45 = vadd.f32 %v510_v39, %v509_v31  ;;  %v518_v49 = vadd.f32 %v517_v40, %v516_v12  ;;  %v545_v11 = vadd.f32 %v909_v26, %v508_v41 }
 0x105   :  { %v484_v50 = vadd.f32 %v483_v43, %v482_v34 }
 0x106   :  { %v512_v51 = vrot.slane %v511_v45, 2  ;;  %v519_v52 = vrot.slane %v518_v49, 2  ;;  %v546_v0 = vrot.slane %v545_v11, 4 }
 0x107   :  { %v485_v53 = vrot.slane %v484_v50, 1 }
 0x108   :  { %v513_v1 = vadd.f32 %v512_v51, %v511_v45  ;;  %v520_v54 = vadd.f32 %v519_v52, %v518_v49  ;;  %v547_v55 = vmax.f32 %v545_v11, %v546_v0 }
 0x109   :  { %v486_v56 = vadd.f32 %v485_v53, %v484_v50 }
 0x10a   :  { %v514_v42 = vrot.slane %v513_v1, 1  ;;  %v521_v48 = vrot.slane %v520_v54, 1  ;;  %v548_v58 = vrot.slane %v547_v55, 2 }
 0x10b   :  { %718 = vrcp.f32 %v486_v56 }
 0x10c   :  { %v1031_v29 = vadd.f32 %v514_v42, %v513_v1  ;;  %v1033_v47 = vadd.f32 %v521_v48, %v520_v54  ;;  %v549_v59 = vmax.f32 %v547_v55, %v548_v58 }
 0x10e   :  { %v523_v26 = vsub.f32 %v1031_v29, %v1004_v44  ;;  %v525_v63 = vsub.f32 %v1033_v47, %v1006_v7  ;;  %v550_v35 = vrot.slane %v549_v59, 1 }
 0x110   :  { %v524_v5 = vmul.f32 %v523_v26, %v523_v26  ;;  %v526_v8 = vmul.f32 %v525_v63, %v525_v63  ;;  %v551_v2 = vmax.f32 %v549_v59, %v550_v35 }
 0x112   :  { %v527_v62 = vadd.f32 %v526_v8, %v524_v5  ;;  %v552_v10 = vsub.f32 %v545_v11, %v551_v2  ;;  %vm566_vm13 = vcmp.ge.f32.partialorder %v545_v11, %v551_v2 }
 0x113   :  { %v567_v13 = vsel %vm566_vm13, %v830_v33, 8 }
 0x114   :  { %v553_v60 = vmul.f32 1.442695, %v552_v10  ;;  %v568_v61 = vrot.slane %v567_v13, 4  ;;  %720 = vrsqrt.f32 %v527_v62  ;;  %vm530_vm1 = vcmp.eq.f32.partialorder %v527_v62, inf }
 0x115   :  { %v719_v14 = vpop.eup %718  ;;  %v533_v3 = vand.u32 2147483648, %v527_v62  ;;  %vm532_vm2 = vcmp.eq.f32.partialorder %v527_v62, 0.0 }
 0x116   :  { %v488_v15 = vmul.f32 %v719_v14, %v717_v27  ;;  %491 = vst [vmem:[%s1074_s3 + $0x6] sm:$0x1] %v719_v14  ;;  %722 = vpow2.f32 %v553_v60  ;;  %vm569_vm14 = vcmp.lt.s32.totalorder %v567_v13, %v568_v61 }
 0x117   :  { %v570_v44 = vsel %vm569_vm14, %v567_v13, %v568_v61 }
 0x118   :  { %673 = vst [vmem:[%s1073_s2 + $0x30] sm:$0xff] %v488_v15  ;;  %v571_v7 = vrot.slane %v570_v44, 2 }
 0x11a   :  { %vm572_vm15 = vcmp.lt.s32.totalorder %v570_v44, %v571_v7 }
 0x11b   :  { %v573_v16 = vsel %vm572_vm15, %v570_v44, %v571_v7 }
 0x11c   :  { %v574_v17 = vrot.slane %v573_v16, 1 }
 0x11e   :  { %v721_v18 = vpop.eup %720  ;;  %vm575_vm0 = vcmp.lt.s32.totalorder %v573_v16, %v574_v17 }
 0x11f   :  { %v576_v4 = vsel %vm575_vm0, %v573_v16, %v574_v17  ;;  %v529_v6 = vmul.f32 %v721_v18, %v527_v62 }
 0x120   :  { %v723_v9 = vpop.eup %722  ;;  %577 = vst [vmem:[%s1075_s4 + $0x7] sm:$0x1] %v576_v4  ;;  %vm578_vm3 = vcmp.eq.s32.totalorder %v830_v33, %v576_v4 }
 0x121   :  { %v555_v19 = vrot.slane %v723_v9, 4  ;;  %v679_v20 = vsel %vm578_vm3, 1.0, %v747_v46  ;;  %v531_v37 = vsel %vm530_vm1, %v527_v62, %v529_v6 }
 0x122   :  { %v581_v22 = vmul.f32 %v730_v38, %v679_v20  ;;  %v588_v27 = vmul.f32 %v731_v24, %v679_v20  ;;  %v534_v23 = vsel %vm532_vm2, %v533_v3, %v531_v37 }
 0x123   :  { %v556_v25 = vadd.f32 %v723_v9, %v555_v19  ;;  %v535_v28 = vadd.f32 %v534_v23, %v1027_v36 }
 0x124   :  { %v582_v30 = vrot.slane %v581_v22, 4  ;;  %v589_v33 = vrot.slane %v588_v27, 4 }
 0x125   :  { %v557_v31 = vrot.slane %v556_v25, 2 }
 0x126   :  { %v583_v12 = vadd.f32 %v582_v30, %v581_v22  ;;  %v590_v46 = vadd.f32 %v589_v33, %v588_v27 }
 0x127   :  { %v558_v32 = vadd.f32 %v557_v31, %v556_v25 }
 0x128   :  { %v584_v34 = vrot.slane %v583_v12, 2  ;;  %v591_v39 = vrot.slane %v590_v46, 2 }
 0x129   :  { %v559_v40 = vrot.slane %v558_v32, 1 }
 0x12a   :  { %v585_v41 = vadd.f32 %v584_v34, %v583_v12  ;;  %v592_v43 = vadd.f32 %v591_v39, %v590_v46 }
 0x12b   :  { %v560_v45 = vadd.f32 %v559_v40, %v558_v32 }
 0x12c   :  { %v586_v49 = vrot.slane %v585_v41, 1  ;;  %v593_v11 = vrot.slane %v592_v43, 1 }
 0x12d   :  { %724 = vrcp.f32 %v560_v45 }
 0x12e   :  { %v587_v50 = vadd.f32 %v586_v49, %v585_v41  ;;  %v594_v51 = vadd.f32 %v593_v11, %v592_v43 }
 0x130   :  { %v595_v52 = vsub.f32 %v587_v50, %v1031_v29  ;;  %v597_v36 = vsub.f32 %v594_v51, %v1033_v47  ;;  %v608_v0 = vsub.f32 %v867_v57, %v587_v50  ;;  %v610_v53 = vsub.f32 %v870_v21, %v594_v51 }
 0x132   :  { %v596_v1 = vmul.f32 %v595_v52, %v595_v52  ;;  %v598_v54 = vmul.f32 %v597_v36, %v597_v36  ;;  %v609_v55 = vmul.f32 %v608_v0, %v608_v0  ;;  %v611_v56 = vmul.f32 %v610_v53, %v610_v53 }
 0x134   :  { %v599_v42 = vadd.f32 %v598_v54, %v596_v1  ;;  %v612_v48 = vadd.f32 %v611_v56, %v609_v55 }
 0x136   :  { %726 = vrsqrt.f32 %v599_v42  ;;  %vm602_vm4 = vcmp.eq.f32.partialorder %v599_v42, inf  ;;  %v605_v21 = vand.u32 2147483648, %v599_v42  ;;  %vm604_vm5 = vcmp.eq.f32.partialorder %v599_v42, 0.0 }
 0x137   :  { %v725_v58 = vpop.eup %724  ;;  %728 = vrsqrt.f32 %v612_v48  ;;  %vm615_vm6 = vcmp.eq.f32.partialorder %v612_v48, inf  ;;  %v618_v26 = vand.u32 2147483648, %v612_v48  ;;  %vm617_vm7 = vcmp.eq.f32.partialorder %v612_v48, 0.0 }
 0x138   :  { %v562_v59 = vmul.f32 %v725_v58, %v723_v9  ;;  %565 = vst [vmem:[%s1074_s3 + $0x7] sm:$0x1] %v725_v58 }
 0x13a   :  { %678 = vst [vmem:[%s1073_s2 + $0x38] sm:$0xff] %v562_v59 }
 0x140   :  { %v727_v57 = vpop.eup %726 }
 0x141   :  { %v729_v29 = vpop.eup %728  ;;  %v601_v47 = vmul.f32 %v727_v57, %v599_v42 }
 0x142   :  { %v614_v63 = vmul.f32 %v729_v29, %v612_v48 }
 0x143   :  { %v603_v35 = vsel %vm602_vm4, %v599_v42, %v601_v47 }
 0x144   :  { %v606_v5 = vsel %vm604_vm5, %v605_v21, %v603_v35  ;;  %v616_v8 = vsel %vm615_vm6, %v612_v48, %v614_v63 }
 0x145   :  { %v607_v2 = vadd.f32 %v606_v5, %v535_v28  ;;  %v619_v62 = vsel %vm617_vm7, %v618_v26, %v616_v8 }
 0x147   :  { %v620_v10 = vadd.f32 %v619_v62, %v607_v2 }
 0x149   :  { %621 = vst [vmem:[%s1076_s5] sm:$0x1] %v620_v10 }
 0x14a   :  { %642 = vsyncpa [#allocation3], 1 }

</bundles_post_ra>
